<compile_context>
chip_gen: v6e
topology: v6e:2x2x1
jax: 0.10.0
libtpu: 0.0.40
codegen_flags: <defaults>
</compile_context>

<pallas_src>
import functools

import jax
import jax.numpy as jnp
from jax.experimental import pallas as pl
from jax.experimental.pallas import tpu as pltpu

EPS = 1e-5


def _pick_m_tile(m, cap=512):
    """Largest divisor of m that is a multiple of 8 and <= cap (fallback: m)."""
    for t in range(min(cap, m), 7, -1):
        if t % 8 == 0 and m % t == 0:
            return t
    return m


def _pick_h_tile(h, wp, max_rows=128):
    """Largest divisor of h with h_tile * wp <= max_rows (acc <= 16 vregs)."""
    best = 1
    for t in range(1, h + 1):
        if h % t == 0 and t * wp <= max_rows:
            best = t
    return best


# ---------------------------------------------------------------------------
# Kernel 1: 1x1 conv as a tiled matmul + single-pass partial BN statistics
# ---------------------------------------------------------------------------
def conv1x1_stats_kernel(x_ref, w_ref, y_ref, stats_ref):
    # x_ref: (TM, Cin); w_ref: (Cin, Cmid); y_ref: (TM, Cmid)
    # stats_ref: (1, 8, Cmid) -- row 0 = partial sum, row 1 = partial sum-sq.
    y = jnp.dot(x_ref[...], w_ref[...], preferred_element_type=jnp.float32)
    y_ref[...] = y
    s = jnp.sum(y, axis=0, keepdims=True)          # (1, Cmid)
    q = jnp.sum(y * y, axis=0, keepdims=True)      # (1, Cmid)
    row = jax.lax.broadcasted_iota(jnp.int32, (8, y.shape[1]), 0)
    stats = jnp.where(row == 0, s, 0.0) + jnp.where(row == 1, q, 0.0)
    stats_ref[...] = stats[None]


# ---------------------------------------------------------------------------
# Kernel 2: fused BN-apply + ReLU + 3x3 conv (padding handled in-kernel)
# ---------------------------------------------------------------------------
def conv3x3_bn_relu_kernel(y_ref, scale_ref, shift_ref, w_ref, o_ref, z_ref,
                           *, H, W, Wp, TH, Cout):
    # y_ref:       (H, W, Cmid)    raw 1x1-conv output of the current image
    # scale/shift: (1, 1, Cmid)    folded BatchNorm affine
    # w_ref:       (3, 3, Cmid, Cout)  (constant index map -> DMA'd once)
    # o_ref:       (TH, W, Cout)   current output row block
    # z_ref:       (H+2, Wp, Cmid) zero-padded, row-pitched activation scratch
    t = pl.program_id(1)

    # Build the padded activation buffer once per image (inner grid axis t);
    # it persists in VMEM across the row-block iterations of this image.
    @pl.when(t == 0)
    def _build():
        z_ref[...] = jnp.zeros_like(z_ref)
        z_ref[1:H + 1, 0:W, :] = jnp.maximum(
            y_ref[...] * scale_ref[...] + shift_ref[...], 0.0)

    Mb = TH * Wp
    C = z_ref.shape[-1]
    acc = jnp.zeros((Mb, Cout), jnp.float32)
    for dy in range(3):
        # dy shift: dynamic slice on the leading (untiled) row axis; the slice
        # is tile-aligned because the row pitch Wp is a multiple of 8.
        base = z_ref[pl.ds(t * TH + dy, TH), :, :].reshape(Mb, C)
        for dx in range(3):
            # dx shift: XLU sublane roll.  The zero pad columns of z make edge
            # masking unnecessary (wrapped / shifted edge values land on zeros
            # or on discarded pitch columns).
            if dx == 1:
                patch = base
            else:
                patch = pltpu.roll(base, shift=(1 - dx) % Mb, axis=0)
            acc = acc + jnp.dot(patch, w_ref[dy, dx],
                                preferred_element_type=jnp.float32)
    o_ref[...] = acc.reshape(TH, Wp, Cout)[:, 0:W, :].astype(o_ref.dtype)


# ---------------------------------------------------------------------------
# Wrapper (NCHW in / NCHW out)
# ---------------------------------------------------------------------------
def forward(x_nchw, w1, gamma, beta, w2):
    N, Cin, H, W = x_nchw.shape
    Cmid = w1.shape[1]
    Cout = w2.shape[3]
    M = N * H * W

    # NCHW -> NHWC -> (M, Cin): unavoidable layout glue at the module boundary.
    x_flat = jnp.transpose(x_nchw, (0, 2, 3, 1)).reshape(M, Cin)

    TM = _pick_m_tile(M)
    G = M // TM

    y_flat, stats = pl.pallas_call(
        conv1x1_stats_kernel,
        out_shape=(jax.ShapeDtypeStruct((M, Cmid), jnp.float32),
                   jax.ShapeDtypeStruct((G, 8, Cmid), jnp.float32)),
        grid=(G,),
        in_specs=[
            pl.BlockSpec((TM, Cin), lambda i: (i, 0)),
            pl.BlockSpec((Cin, Cmid), lambda i: (0, 0)),
        ],
        out_specs=[
            pl.BlockSpec((TM, Cmid), lambda i: (i, 0)),
            pl.BlockSpec((1, 8, Cmid), lambda i: (i, 0, 0)),
        ],
        compiler_params=pltpu.CompilerParams(
            dimension_semantics=("parallel",)),
    )(x_flat, w1)

    # BN finalize: tiny (Cmid,)-sized math folded into one scale/shift pair.
    cnt = jnp.float32(M)
    mean = stats[:, 0, :].sum(axis=0) / cnt
    ex2 = stats[:, 1, :].sum(axis=0) / cnt
    var = jnp.maximum(ex2 - mean * mean, 0.0)
    inv = jax.lax.rsqrt(var + EPS)
    scale = (gamma * inv).reshape(1, 1, Cmid)
    shift = (beta - mean * gamma * inv).reshape(1, 1, Cmid)

    Wp = ((W + 1) + 7) // 8 * 8           # row pitch: >= W+1, multiple of 8
    TH = _pick_h_tile(H, Wp)              # output rows per grid step
    HT = H // TH

    y3 = y_flat.reshape(N * H, W, Cmid)   # metadata-only reshape

    kern = functools.partial(conv3x3_bn_relu_kernel,
                             H=H, W=W, Wp=Wp, TH=TH, Cout=Cout)
    out = pl.pallas_call(
        kern,
        out_shape=jax.ShapeDtypeStruct((N * H, W, Cout), jnp.float32),
        grid=(N, HT),
        in_specs=[
            pl.BlockSpec((H, W, Cmid), lambda n, t: (n, 0, 0)),
            pl.BlockSpec((1, 1, Cmid), lambda n, t: (0, 0, 0)),
            pl.BlockSpec((1, 1, Cmid), lambda n, t: (0, 0, 0)),
            pl.BlockSpec((3, 3, Cmid, Cout), lambda n, t: (0, 0, 0, 0)),
        ],
        out_specs=pl.BlockSpec((TH, W, Cout),
                               lambda n, t: (n * HT + t, 0, 0)),
        scratch_shapes=[pltpu.VMEM((H + 2, Wp, Cmid), jnp.float32)],
        compiler_params=pltpu.CompilerParams(
            dimension_semantics=("parallel", "arbitrary")),
    )(y3, scale, shift, w2)

    return jnp.transpose(out.reshape(N, H, W, Cout), (0, 3, 1, 2))


# ---------------------------------------------------------------------------
# Pure-JAX reference (for sanity check)
# ---------------------------------------------------------------------------
def reference(x_nchw, w1, gamma, beta, w2):
    x_nhwc = jnp.transpose(x_nchw, (0, 2, 3, 1))
    N, H, W, Cin = x_nhwc.shape
    Cmid = w1.shape[1]
    hi = jax.lax.Precision.HIGHEST
    y = jnp.matmul(x_nhwc.reshape(-1, Cin), w1, precision=hi)
    mean = y.mean(axis=0, keepdims=True)
    var = jnp.square(y - mean).mean(axis=0, keepdims=True)
    y = (y - mean) * jax.lax.rsqrt(var + EPS) * gamma + beta
    y = jnp.maximum(y, 0.0).reshape(N, H, W, Cmid)
    out = jax.lax.conv_general_dilated(
        y, w2, window_strides=(1, 1), padding="SAME",
        dimension_numbers=("NHWC", "HWIO", "NHWC"), precision=hi)
    return jnp.transpose(out, (0, 3, 1, 2))


if __name__ == "__main__":
    # Exact module shapes: 1x512x28x28 input, 512->128 (1x1), 128->128 (3x3).
    N, Cin, Cmid, Cout, H, W = 1, 512, 128, 128, 28, 28

    key = jax.random.PRNGKey(0)
    kx, kw1, kw2, kg, kb = jax.random.split(key, 5)

    x = jax.random.normal(kx, (N, Cin, H, W), dtype=jnp.float32)
    w1 = jax.random.normal(kw1, (Cin, Cmid), dtype=jnp.float32) / jnp.sqrt(Cin)
    w2 = jax.random.normal(kw2, (3, 3, Cmid, Cout),
                           dtype=jnp.float32) / jnp.sqrt(9 * Cmid)
    gamma = 1.0 + 0.1 * jax.random.normal(kg, (Cmid,), dtype=jnp.float32)
    beta = 0.1 * jax.random.normal(kb, (Cmid,), dtype=jnp.float32)

    out = jax.block_until_ready(forward(x, w1, gamma, beta, w2))

    ref = reference(x, w1, gamma, beta, w2)
    assert out.shape == (N, Cout, H, W), out.shape
    max_err = float(jnp.max(jnp.abs(out - ref)))
    assert jnp.allclose(out, ref, rtol=2e-3, atol=2e-3), max_err

    print("KERNEL_OK")
</pallas_src>

<mosaic_0001>
module attributes {stable_mosaic.version = 11 : i64} {
  func.func @conv1x1_stats_kernel(%arg0: i32, %arg1: memref<392x512xf32, #tpu.memory_space<vmem>>, %arg2: memref<512x128xf32, #tpu.memory_space<vmem>>, %arg3: memref<392x128xf32, #tpu.memory_space<vmem>>, %arg4: memref<1x8x128xf32, #tpu.memory_space<vmem>>) attributes {dimension_semantics = [#tpu.dimension_semantics<parallel>], iteration_bounds = array<i64: 2>, scalar_prefetch = 0 : i64, scratch_operands = 0 : i64, tpu.core_type = #tpu.core_type<tc>, window_params = [{transform_indices = @transform_0, window_bounds = array<i64: 392, 512>}, {pipeline_mode = #tpu.pipeline_mode<synchronous>, transform_indices = @transform_1, window_bounds = array<i64: 512, 128>}, {transform_indices = @transform_2, window_bounds = array<i64: 392, 128>}, {transform_indices = @transform_3, window_bounds = array<i64: 1, 8, 128>}]} {
    %c0 = arith.constant 0 : index
    %c0_0 = arith.constant 0 : index
    %0 = vector.load %arg1[%c0, %c0_0] : memref<392x512xf32, #tpu.memory_space<vmem>>, vector<392x512xf32>
    %c0_1 = arith.constant 0 : index
    %c0_2 = arith.constant 0 : index
    %1 = vector.load %arg2[%c0_1, %c0_2] : memref<512x128xf32, #tpu.memory_space<vmem>>, vector<512x128xf32>
    %cst = arith.constant dense<0.000000e+00> : vector<392x128xf32>
    %2 = tpu.matmul %0, %1, %cst {dimension_numbers = #tpu.dot_dimension_numbers<[1], [0], [0], [1], [0, 0, 1, 1], [], []>} : vector<392x512xf32>, vector<512x128xf32>, vector<392x128xf32> -> vector<392x128xf32>
    %c0_3 = arith.constant 0 : index
    %c0_4 = arith.constant 0 : index
    %3 = vector.load %arg3[%c0_3, %c0_4] : memref<392x128xf32, #tpu.memory_space<vmem>>, vector<392x128xf32>
    tpu.vector_store %arg3[%c0_3, %c0_4], %2 {strides = array<i32>} : memref<392x128xf32, #tpu.memory_space<vmem>>, vector<392x128xf32>,
    %cst_5 = arith.constant dense<0.000000e+00> : vector<128xf32>
    %4 = vector.multi_reduction <add>, %2, %cst_5 [0] : vector<392x128xf32> to vector<128xf32>
    %5 = vector.shape_cast %4 : vector<128xf32> to vector<1x128xf32>
    %6 = arith.mulf %2, %2 : vector<392x128xf32>
    %cst_6 = arith.constant dense<0.000000e+00> : vector<128xf32>
    %7 = vector.multi_reduction <add>, %6, %cst_6 [0] : vector<392x128xf32> to vector<128xf32>
    %8 = vector.shape_cast %7 : vector<128xf32> to vector<1x128xf32>
    %9 = tpu.iota {dimensions = array<i32: 0>} : vector<8x128xi32>
    %c0_i32 = arith.constant 0 : i32
    %10 = vector.broadcast %c0_i32 : i32 to vector<8x128xi32>
    %11 = arith.cmpi eq, %9, %10 : vector<8x128xi32>
    %cst_7 = arith.constant 0.000000e+00 : f32
    %12 = vector.shape_cast %5 : vector<1x128xf32> to vector<1x128xf32>
    %13 = vector.broadcast %12 : vector<1x128xf32> to vector<8x128xf32>
    %14 = vector.broadcast %cst_7 : f32 to vector<8x128xf32>
    %15 = arith.select %11, %13, %14 : vector<8x128xi1>, vector<8x128xf32>
    %c1_i32 = arith.constant 1 : i32
    %16 = vector.broadcast %c1_i32 : i32 to vector<8x128xi32>
    %17 = arith.cmpi eq, %9, %16 : vector<8x128xi32>
    %cst_8 = arith.constant 0.000000e+00 : f32
    %18 = vector.shape_cast %8 : vector<1x128xf32> to vector<1x128xf32>
    %19 = vector.broadcast %18 : vector<1x128xf32> to vector<8x128xf32>
    %20 = vector.broadcast %cst_8 : f32 to vector<8x128xf32>
    %21 = arith.select %17, %19, %20 : vector<8x128xi1>, vector<8x128xf32>
    %22 = arith.addf %15, %21 : vector<8x128xf32>
    %23 = vector.shape_cast %22 : vector<8x128xf32> to vector<1x8x128xf32>
    %c0_9 = arith.constant 0 : index
    %c0_10 = arith.constant 0 : index
    %c0_11 = arith.constant 0 : index
    %24 = vector.load %arg4[%c0_9, %c0_10, %c0_11] : memref<1x8x128xf32, #tpu.memory_space<vmem>>, vector<1x8x128xf32>
    tpu.vector_store %arg4[%c0_9, %c0_10, %c0_11], %23 {strides = array<i32>} : memref<1x8x128xf32, #tpu.memory_space<vmem>>, vector<1x8x128xf32>,
    return
  }
  func.func @transform_0(%arg0: i32) -> (i32, i32) {
    %c0_i32 = arith.constant 0 : i32
    %c0_i32_0 = arith.constant 0 : i32
    return %arg0, %c0_i32 : i32, i32
  }
  func.func @transform_1(%arg0: i32) -> (i32, i32) {
    %c0_i32 = arith.constant 0 : i32
    %c0_i32_0 = arith.constant 0 : i32
    %c0_i32_1 = arith.constant 0 : i32
    return %c0_i32, %c0_i32_0 : i32, i32
  }
  func.func @transform_2(%arg0: i32) -> (i32, i32) {
    %c0_i32 = arith.constant 0 : i32
    %c0_i32_0 = arith.constant 0 : i32
    return %arg0, %c0_i32 : i32, i32
  }
  func.func @transform_3(%arg0: i32) -> (i32, i32, i32) {
    %c0_i32 = arith.constant 0 : i32
    %c0_i32_0 = arith.constant 0 : i32
    %c0_i32_1 = arith.constant 0 : i32
    return %arg0, %c0_i32, %c0_i32_0 : i32, i32, i32
  }
}

</mosaic_0001>

<bundles_post_ra>
// kernel: tpu_custom_call.1
= control target key start
LH: loop header
LB: loop body
LE: loop exit
PB: predicated region body
PF: predicated region fallthrough
CT: control target
= control target key end

     0   :  { %9 = vsyncpa [#allocation3], 0  ;;  %s2382_s0 = inlined_call_operand.hbm [shape: f32[784,512], index: 0, kind: input, shape index: {}]   ;;  %s2383_s1 = inlined_call_operand.hbm [shape: f32[512,128], index: 1, kind: input, shape index: {}]   ;;  %s2384_s2 = inlined_call_operand.hbm [shape: f32[784,128], index: 2, kind: output, shape index: {0}]   ;;  %s2385_s3 = inlined_call_operand.hbm [shape: f32[2,8,128], index: 3, kind: output, shape index: {1}]  }
   0x1   :  { %11 = vsyncpa [#allocation3 + $0x1], 0 }
   0x2   :  { %12 = vsyncpa [#allocation6], 0 }
   0x3   :  { %13 = vsyncpa [#allocation4], 0 }
   0x4   :  { %15 = vsyncpa [#allocation4 + $0x1], 0 }
   0x5   :  { %16 = vsyncpa [#allocation9], 0 }
   0x6   :  { %18 = vsyncpa [#allocation9 + $0x1], 0  ;;  %s1734_s12 = smov 0   ;;  %s1736_s13 = smov 0  }
   0x7   :  { %s1738_s14 = smov 0   ;;  %s1740_s15 = smov 0  }
   0x8 LB: > { %s1755_s16 = sadd.s32 4294967295, %s1701_s15   ;;  %s1459_s17 = sadd.s32 4294967294, %s1701_s15   ;;  %s1701_s15 = sphi %s1740_s15, %s2407_s15   ;;  %s1697_s14 = sphi %s1738_s14, %s2406_s14   ;;  %s1693_s13 = sphi %s1736_s13, %s2405_s13   ;;  %s1689_s12 = sphi %s1734_s12, %s2404_s12  }
   0x9   : > { %p44_p0 = scmp.ne.s32.totalorder %s1693_s13, %s1689_s12  ;;  %p2386_p1 = scmp.eq.s32.totalorder %s1755_s16, 0 }
   0xa   : > { %p95_p3 = scmp.eq.s32.totalorder %s1459_s17, 1  ;;  %p1460_p5 = scmp.ge.s32.totalorder %s1701_s15, 1 }
   0xb   : > { %p1764_p4 = por %p2386_p1, %p44_p0  ;;  %p128_p7 = scmp.lt.s32.totalorder %s1701_s15, 3 }
   0xc   : > { %p1769_p6 = por %p95_p3, %p44_p0  ;;  %s1703_s21 = smov [#allocation5]  }
   0xd   : > { %s2390_s18 = scalar_select %p1764_p4, 1, 0 }
   0xe   : > { %s2391_s19 = scalar_select %p1769_p6, 1, 0 }
   0xf   : > { %p1774_p8 = pnand %p1460_p5, %p128_p7  ;;  %s140_s22 = sshll.u32 %s1703_s21, 4  ;;  %s141_s22 = int_to_ptr.vmem [resolvable:$true] %s140_s22 }
  0x10   : > { %s1788_s24 = sadd.s32 1, %s1701_s15   ;;  %s31_s25 = sadd.s32 1, %s1697_s14 }
  0x11   : > { %s2392_s20 = scalar_select %p1774_p8, 1, 0 }
  0x12   : > { %p1490_p9 = pneg %p1774_p8  ;;  %s28_s26 = ssub.s32 %s1701_s15, %s1788_s24 }
  0x13   : > { %s1560_s27 = scalar_lea.vmem %s141_s22, 8192  ;;  %p1568_p5 = scmp.lt.s32.totalorder %s141_s22, %s141_s22 }
  0x14   : > { %p1783_p11 = pnand %p1490_p9, %p2386_p1  ;;  %p1561_p13 = scmp.ne.s32.totalorder %s141_s22, %s1560_s27 }
  0x15   : > { %p1569_p7 = scmp.lt.s32.totalorder %s1560_s27, %s1560_s27 }
  0x16   : > { %p1551_p12 = pneg %p1783_p11 }
  0x17   : > { %p1570_p10 = por %p1569_p7, %p1568_p5 }
  0x18   : > { %p1563_p0 = pnand %p1561_p13, %p1551_p12 }
  0x1a   : > { %p1564_p3 = pneg %p1563_p0 }
  0x1c   : > { %p1571_p2 = pnand %p1570_p10, %p1564_p3 }
  0x1e   : > { %1574 = shalt.err (!%p1571_p2)
}
  0x1f   : > { %s1704_s28 = smov 128   ;;  %s1705_s29 = smov 8  }
  0x20   : > { %1493 = dma.hbm_to_vmem [thread:$0]  (!%p1783_p11), %s2383_s1, 8192, %s141_s22, [#allocation6], %s1704_s28, %s1704_s28, %s1705_s29  }
  0x21   : > { %p29_p9 = scmp.eq.s32.totalorder %s28_s26, 0  ;;  %p38_p12 = scmp.ne.s32.totalorder %s1697_s14, %s1693_s13 }
  0x22   : > { %p39_p10 = scmp.eq.s32.totalorder %s1701_s15, 0  ;;  %p1506_p2 = scmp.lt.s32.totalorder %s1701_s15, 2 }
  0x23   : > { %s1805_s5 = scalar_select %p29_p9, %s1697_s14, %s31_s25  }
  0x24   : > { %p40_p13 = por %p39_p10, %p38_p12  ;;  %p2394_p0 = scmp.eq.s32.totalorder %s1755_s16, 1 }
  0x25   : > { %s154_s7 = sand.u32 1, %s1697_s14   ;;  %s1476_s8 = smul.u32 25088, %s1701_s15 }
  0x26   : > { %p1809_p3 = por %p2394_p0, %p38_p12  ;;  %s1477_s9 = smul.u32 1568, %s154_s7 }
  0x27   : > { %s1818_s17 = scalar_lea.hbm %s2382_s0, %s1476_s8  ;;  %p1820_p11 = pnand %p1506_p2, %p40_p13 }
  0x28   : > { %s2395_s6 = scalar_select %p1809_p3, 1, 0 }
  0x29   : > { %s158_s22 = scalar_lea.vmem [#allocation2], %s1477_s9  ;;  %s1826_s25 = scalar_lea.sflag [#allocation3], %s154_s7 }
  0x2a   : > { %s166_s23 = sshll.u32 %s158_s22, 4  ;;  %s1575_s26 = scalar_lea.hbm %s1818_s17, 25088  ;;  %s1824_s23 = int_to_ptr.vmem [resolvable:$true] %s166_s23 }
  0x2b   : > { %p1576_p5 = scmp.ne.s32.totalorder %s1818_s17, %s1575_s26  ;;  %p1577_p7 = pneg %p1820_p11 }
  0x2c   : > { %s1580_s29 = scalar_lea.hbm %s2382_s0, 50176  ;;  %p1581_p10 = scmp.lt.s32.totalorder %s1818_s17, %s2382_s0 }
  0x2d   : > { %p1578_p9 = pnand %p1577_p7, %p1576_p5  ;;  %p1582_p2 = scmp.lt.s32.totalorder %s1580_s29, %s1575_s26 }
  0x2f   : > { %p1579_p12 = pneg %p1578_p9  ;;  %p1583_p13 = por %p1582_p2, %p1581_p10 }
  0x31   : > { %p1584_p0 = pnand %p1583_p13, %p1579_p12 }
  0x33   : > { %1587 = shalt.err (!%p1584_p0)
}
  0x34   : > { %s1588_s7 = scalar_lea.vmem %s1824_s23, 25088  ;;  %s1706_s8 = smov [#allocation2]  }
  0x35   : > { %p1589_p1 = scmp.ne.s32.totalorder %s1824_s23, %s1588_s7  ;;  %s1593_s9 = sshll.u32 %s1706_s8, 4  ;;  %s1594_s9 = int_to_ptr.vmem [resolvable:$false] %s1593_s9 }
  0x36   : > { %s1595_s10 = scalar_lea.vmem %s1594_s9, 50176  ;;  %p1596_p9 = scmp.lt.s32.totalorder %s1824_s23, %s1594_s9 }
  0x37   : > { %p1591_p6 = pnand %p1589_p1, %p1577_p7  ;;  %p1597_p3 = scmp.lt.s32.totalorder %s1595_s10, %s1588_s7 }
  0x39   : > { %p1592_p5 = pneg %p1591_p6  ;;  %p1598_p4 = por %p1597_p3, %p1596_p9 }
  0x3b   : > { %p1599_p8 = pnand %p1598_p4, %p1592_p5 }
  0x3d   : > { %1602 = shalt.err (!%p1599_p8)
}
  0x3e   : > { %s1707_s11 = smov 512   ;;  %s1708_s22 = smov 32  }
  0x3f   : > { %1497 = dma.hbm_to_vmem [thread:$0]  (!%p1820_p11), %s1818_s17, 25088, %s1824_s23, %s1826_s25, %s1707_s11, %s1707_s11, %s1708_s22  }
  0x40   : > { %p2397_p1 = scmp.ne.s32.totalorder %s2392_s20, 0 }
  0x41   : > { %s1850_s26 = sand.u32 (!%p2397_p1), 1, %s1693_s13   ;;  %p2398_p4 = scmp.ne.s32.totalorder (!%p2397_p1), %s2390_s18, 0 }
  0x42   : > { %178 = sbr.rel (%p2397_p1) target bundleno = 570 (0x23a), region = 28  ;;  %s181_s28 = scalar_lea.sflag (!%p2397_p1), [#allocation3], %s1850_s26 }
  0x43   : > { %s1478_s27 = smul.u32 (!%p2397_p1), 1568, %s1850_s26 }
  0x45   : > { %s1854_s29 = scalar_lea.vmem (!%p2397_p1), [#allocation2], %s1478_s27 }
  0x47   : > { %1672 = dma.done.wait (%p2398_p4), %s181_s28, 25088  }
  0x48   : > { %1674 = vsyncadd (%p2398_p4), %s181_s28, 4294942208  ;;  %p2399_p6 = scmp.eq.s32.totalorder %s1755_s16, 0 }
  0x4a   : > { %1676 = dma.done.wait (%p2399_p6), [#allocation6], 8192   ;;  %p2400_p8 = pmov %p2399_p6 }
  0x4b   : > { %v1709_v0 = vmov 0.0   ;;  %v429_v1 = vld [vmem:[#allocation5 + $0x78] sm:$0xff]  ;;  %v428_v3 = vld [vmem:[#allocation5 + $0x70] sm:$0xff]  ;;  %v427_v5 = vld [vmem:[#allocation5 + $0x68] sm:$0xff]  ;;  %s1479_s18 = smul.u32 392, %s1850_s26  ;;  %s1313_s4 = scalar_lea.sflag [#allocation4], %s1850_s26 }
  0x4c   : > { %1678 = vsyncadd (%p2400_p8), [#allocation6], 4294959104  ;;  %478 = vmatprep.subr.mxu0 %v1709_v0  ;;  %788 = vmatprep.subr.mxu1 %v1709_v0  ;;  %v461_v2 = vld [vmem:[#allocation5 + $0x178] sm:$0xff]  ;;  %v460_v4 = vld [vmem:[#allocation5 + $0x170] sm:$0xff]  ;;  %s1475_s17 = smul.u32 6272, %s1755_s16  ;;  %p2401_p11 = scmp.ne.s32.totalorder %s2395_s6, 0 }
  0x4d   : > { %479 = vmatpush1.msra.mxu0 %v429_v1  ;;  %789 = vmatpush1.msra.mxu1 %v461_v2  ;;  %v459_v6 = vld [vmem:[#allocation5 + $0x168] sm:$0xff]  ;;  %v426_v7 = vld [vmem:[#allocation5 + $0x60] sm:$0xff]  ;;  %v425_v9 = vld [vmem:[#allocation5 + $0x58] sm:$0xff]  ;;  %s2125_s20 = scalar_lea.vmem [#allocation7], %s1479_s18  ;;  %s1710_s8 = smov [#allocation7]  }
  0x4e   : > { %480 = vmatprep.subr.mxu0 %v1709_v0  ;;  %790 = vmatprep.subr.mxu1 %v1709_v0  ;;  %v458_v8 = vld [vmem:[#allocation5 + $0x160] sm:$0xff]  ;;  %v457_v10 = vld [vmem:[#allocation5 + $0x158] sm:$0xff]  ;;  %v424_v11 = vld [vmem:[#allocation5 + $0x50] sm:$0xff]  ;;  %s1331_s21 = sshll.u32 %s2125_s20, 4  ;;  %s2318_s30 = scalar_lea.hbm %s2384_s2, %s1475_s17  ;;  %s2320_s21 = int_to_ptr.vmem [resolvable:$true] %s1331_s21 }
  0x4f   : > { %481 = vmatpush1.msra.mxu0 %v428_v3  ;;  %791 = vmatpush1.msra.mxu1 %v460_v4  ;;  %v456_v12 = vld [vmem:[#allocation5 + $0x150] sm:$0xff]  ;;  %v423_v13 = vld [vmem:[#allocation5 + $0x48] sm:$0xff]  ;;  %v422_v15 = vld [vmem:[#allocation5 + $0x40] sm:$0xff]  ;;  %s1603_s7 = scalar_lea.vmem %s2320_s21, 6272  ;;  %s1607_s9 = sshll.u32 %s1710_s8, 4  ;;  %s1608_s9 = int_to_ptr.vmem [resolvable:$false] %s1607_s9 }
  0x50   : > { %482 = vmatprep.subr.mxu0 %v1709_v0  ;;  %792 = vmatprep.subr.mxu1 %v1709_v0  ;;  %v455_v14 = vld [vmem:[#allocation5 + $0x148] sm:$0xff]  ;;  %v454_v16 = vld [vmem:[#allocation5 + $0x140] sm:$0xff]  ;;  %v421_v17 = vld [vmem:[#allocation5 + $0x38] sm:$0xff]  ;;  %p1604_p3 = scmp.ne.s32.totalorder %s2320_s21, %s1603_s7  ;;  %s1609_s10 = scalar_lea.vmem %s1608_s9, 12544 }
  0x51   : > { %483 = vmatpush1.msra.mxu0 %v427_v5  ;;  %793 = vmatpush1.msra.mxu1 %v459_v6  ;;  %v453_v18 = vld [vmem:[#allocation5 + $0x138] sm:$0xff]  ;;  %v420_v19 = vld [vmem:[#allocation5 + $0x30] sm:$0xff]  ;;  %v419_v21 = vld [vmem:[#allocation5 + $0x28] sm:$0xff]  ;;  %p1610_p10 = scmp.lt.s32.totalorder %s2320_s21, %s1608_s9  ;;  %p1611_p2 = scmp.lt.s32.totalorder %s1609_s10, %s1603_s7 }
  0x52   : > { %484 = vmatprep.subr.mxu0 %v1709_v0  ;;  %794 = vmatprep.subr.mxu1 %v1709_v0  ;;  %v452_v20 = vld [vmem:[#allocation5 + $0x130] sm:$0xff]  ;;  %v451_v22 = vld [vmem:[#allocation5 + $0x128] sm:$0xff]  ;;  %v418_v23 = vld [vmem:[#allocation5 + $0x20] sm:$0xff]  ;;  %p1605_p7 = pnand %p1604_p3, %p2401_p11 }
  0x53   : > { %485 = vmatpush1.msra.mxu0 %v426_v7  ;;  %795 = vmatpush1.msra.mxu1 %v458_v8  ;;  %v450_v24 = vld [vmem:[#allocation5 + $0x120] sm:$0xff]  ;;  %v417_v25 = vld [vmem:[#allocation5 + $0x18] sm:$0xff]  ;;  %v416_v27 = vld [vmem:[#allocation5 + $0x10] sm:$0xff]  ;;  %p1612_p13 = por %p1611_p2, %p1610_p10 }
  0x54   : > { %486 = vmatprep.subr.mxu0 %v1709_v0  ;;  %796 = vmatprep.subr.mxu1 %v1709_v0  ;;  %v449_v26 = vld [vmem:[#allocation5 + $0x118] sm:$0xff]  ;;  %v448_v28 = vld [vmem:[#allocation5 + $0x110] sm:$0xff]  ;;  %v415_v29 = vld [vmem:[#allocation5 + $0x8] sm:$0xff]  ;;  %p1606_p12 = pneg %p1605_p7 }
  0x55   : > { %487 = vmatpush1.msra.mxu0 %v425_v9  ;;  %797 = vmatpush1.msra.mxu1 %v457_v10  ;;  %v447_v30 = vld [vmem:[#allocation5 + $0x108] sm:$0xff]  ;;  %v414_v31 = vld [vmem:[#allocation5] sm:$0xff]  ;;  %v445_v33 = vld [vmem:[#allocation5 + $0xf8] sm:$0xff] }
  0x56   : > { %488 = vmatprep.subr.mxu0 %v1709_v0  ;;  %798 = vmatprep.subr.mxu1 %v1709_v0  ;;  %v446_v32 = vld [vmem:[#allocation5 + $0x100] sm:$0xff]  ;;  %v477_v34 = vld [vmem:[#allocation5 + $0x1f8] sm:$0xff]  ;;  %v444_v35 = vld [vmem:[#allocation5 + $0xf0] sm:$0xff]  ;;  %p1613_p0 = pnand %p1612_p13, %p1606_p12 }
  0x57   : > { %489 = vmatpush1.msra.mxu0 %v424_v11  ;;  %799 = vmatpush1.msra.mxu1 %v456_v12  ;;  %v476_v36 = vld [vmem:[#allocation5 + $0x1f0] sm:$0xff]  ;;  %v443_v37 = vld [vmem:[#allocation5 + $0xe8] sm:$0xff]  ;;  %v442_v39 = vld [vmem:[#allocation5 + $0xe0] sm:$0xff] }
  0x58   : > { %490 = vmatprep.subr.mxu0 %v1709_v0  ;;  %800 = vmatprep.subr.mxu1 %v1709_v0  ;;  %v475_v38 = vld [vmem:[#allocation5 + $0x1e8] sm:$0xff]  ;;  %v474_v40 = vld [vmem:[#allocation5 + $0x1e0] sm:$0xff]  ;;  %v441_v41 = vld [vmem:[#allocation5 + $0xd8] sm:$0xff] }
  0x59   : > { %491 = vmatpush1.msra.mxu0 %v423_v13  ;;  %801 = vmatpush1.msra.mxu1 %v455_v14  ;;  %v473_v42 = vld [vmem:[#allocation5 + $0x1d8] sm:$0xff]  ;;  %v440_v43 = vld [vmem:[#allocation5 + $0xd0] sm:$0xff]  ;;  %v439_v45 = vld [vmem:[#allocation5 + $0xc8] sm:$0xff] }
  0x5a   : > { %492 = vmatprep.subr.mxu0 %v1709_v0  ;;  %802 = vmatprep.subr.mxu1 %v1709_v0  ;;  %v472_v44 = vld [vmem:[#allocation5 + $0x1d0] sm:$0xff]  ;;  %v471_v46 = vld [vmem:[#allocation5 + $0x1c8] sm:$0xff]  ;;  %v438_v47 = vld [vmem:[#allocation5 + $0xc0] sm:$0xff] }
  0x5b   : > { %493 = vmatpush1.msra.mxu0 %v422_v15  ;;  %803 = vmatpush1.msra.mxu1 %v454_v16  ;;  %v470_v48 = vld [vmem:[#allocation5 + $0x1c0] sm:$0xff]  ;;  %v437_v49 = vld [vmem:[#allocation5 + $0xb8] sm:$0xff]  ;;  %v436_v51 = vld [vmem:[#allocation5 + $0xb0] sm:$0xff] }
  0x5c   : > { %494 = vmatprep.subr.mxu0 %v1709_v0  ;;  %804 = vmatprep.subr.mxu1 %v1709_v0  ;;  %v469_v50 = vld [vmem:[#allocation5 + $0x1b8] sm:$0xff]  ;;  %v468_v52 = vld [vmem:[#allocation5 + $0x1b0] sm:$0xff]  ;;  %v435_v53 = vld [vmem:[#allocation5 + $0xa8] sm:$0xff] }
  0x5d   : > { %495 = vmatpush1.msra.mxu0 %v421_v17  ;;  %805 = vmatpush1.msra.mxu1 %v453_v18  ;;  %v467_v54 = vld [vmem:[#allocation5 + $0x1a8] sm:$0xff]  ;;  %v434_v55 = vld [vmem:[#allocation5 + $0xa0] sm:$0xff]  ;;  %v433_v57 = vld [vmem:[#allocation5 + $0x98] sm:$0xff] }
  0x5e   : > { %496 = vmatprep.subr.mxu0 %v1709_v0  ;;  %806 = vmatprep.subr.mxu1 %v1709_v0  ;;  %v466_v56 = vld [vmem:[#allocation5 + $0x1a0] sm:$0xff]  ;;  %v465_v58 = vld [vmem:[#allocation5 + $0x198] sm:$0xff]  ;;  %v432_v59 = vld [vmem:[#allocation5 + $0x90] sm:$0xff] }
  0x5f   : > { %497 = vmatpush1.msra.mxu0 %v420_v19  ;;  %807 = vmatpush1.msra.mxu1 %v452_v20  ;;  %v464_v60 = vld [vmem:[#allocation5 + $0x190] sm:$0xff]  ;;  %v431_v61 = vld [vmem:[#allocation5 + $0x88] sm:$0xff]  ;;  %v430_v63 = vld [vmem:[#allocation5 + $0x80] sm:$0xff] }
  0x60   : > { %498 = vmatprep.subr.mxu0 %v1709_v0  ;;  %808 = vmatprep.subr.mxu1 %v1709_v0  ;;  %v463_v62 = vld [vmem:[#allocation5 + $0x188] sm:$0xff]  ;;  %v462_v2 = vld [vmem:[#allocation5 + $0x180] sm:$0xff]  ;;  %v221_v3 = vld [vmem:[%s1854_s29 + $0x18] sm:$0xff] }
  0x61   : > { %499 = vmatpush1.msra.mxu0 %v419_v21  ;;  %809 = vmatpush1.msra.mxu1 %v451_v22  ;;  %v219_v1 = vld [vmem:[%s1854_s29 + $0x8] sm:$0xff]  ;;  %v218_v4 = vld [vmem:[%s1854_s29] sm:$0xff]  ;;  %v220_v5 = vld [vmem:[%s1854_s29 + $0x10] sm:$0xff] }
  0x62   : > { %500 = vmatprep.subr.mxu0 %v1709_v0  ;;  %810 = vmatprep.subr.mxu1 %v1709_v0  ;;  %v223_v6 = vld [vmem:[%s1854_s29 + $0x28] sm:$0xff]  ;;  %v225_v7 = vld [vmem:[%s1854_s29 + $0x38] sm:$0xff]  ;;  %v222_v8 = vld [vmem:[%s1854_s29 + $0x20] sm:$0xff] }
  0x63   : > { %501 = vmatpush1.msra.mxu0 %v418_v23  ;;  %811 = vmatpush1.msra.mxu1 %v450_v24  ;;  %v227_v9 = vld [vmem:[%s1854_s29 + $0x48] sm:$0xff]  ;;  %v229_v10 = vld [vmem:[%s1854_s29 + $0x58] sm:$0xff]  ;;  %v226_v11 = vld [vmem:[%s1854_s29 + $0x40] sm:$0xff] }
  0x64   : > { %502 = vmatprep.subr.mxu0 %v1709_v0  ;;  %812 = vmatprep.subr.mxu1 %v1709_v0  ;;  %v228_v12 = vld [vmem:[%s1854_s29 + $0x50] sm:$0xff]  ;;  %v231_v13 = vld [vmem:[%s1854_s29 + $0x68] sm:$0xff]  ;;  %v233_v14 = vld [vmem:[%s1854_s29 + $0x78] sm:$0xff] }
  0x65   : > { %503 = vmatpush1.msra.mxu0 %v417_v25  ;;  %813 = vmatpush1.msra.mxu1 %v449_v26  ;;  %v230_v15 = vld [vmem:[%s1854_s29 + $0x60] sm:$0xff]  ;;  %v232_v16 = vld [vmem:[%s1854_s29 + $0x70] sm:$0xff]  ;;  %v235_v17 = vld [vmem:[%s1854_s29 + $0x88] sm:$0xff] }
  0x66   : > { %504 = vmatprep.subr.mxu0 %v1709_v0  ;;  %814 = vmatprep.subr.mxu1 %v1709_v0  ;;  %v237_v18 = vld [vmem:[%s1854_s29 + $0x98] sm:$0xff]  ;;  %v234_v19 = vld [vmem:[%s1854_s29 + $0x80] sm:$0xff]  ;;  %v236_v20 = vld [vmem:[%s1854_s29 + $0x90] sm:$0xff] }
  0x67   : > { %505 = vmatpush1.msra.mxu0 %v416_v27  ;;  %815 = vmatpush1.msra.mxu1 %v448_v28  ;;  %v239_v21 = vld [vmem:[%s1854_s29 + $0xa8] sm:$0xff]  ;;  %v241_v22 = vld [vmem:[%s1854_s29 + $0xb8] sm:$0xff]  ;;  %v238_v23 = vld [vmem:[%s1854_s29 + $0xa0] sm:$0xff] }
  0x68   : > { %506 = vmatprep.subr.mxu0 %v1709_v0  ;;  %816 = vmatprep.subr.mxu1 %v1709_v0  ;;  %v240_v24 = vld [vmem:[%s1854_s29 + $0xb0] sm:$0xff]  ;;  %v243_v25 = vld [vmem:[%s1854_s29 + $0xc8] sm:$0xff]  ;;  %v245_v26 = vld [vmem:[%s1854_s29 + $0xd8] sm:$0xff] }
  0x69   : > { %507 = vmatpush1.msra.mxu0 %v415_v29  ;;  %817 = vmatpush1.msra.mxu1 %v447_v30  ;;  %v242_v27 = vld [vmem:[%s1854_s29 + $0xc0] sm:$0xff]  ;;  %v244_v28 = vld [vmem:[%s1854_s29 + $0xd0] sm:$0xff]  ;;  %v247_v29 = vld [vmem:[%s1854_s29 + $0xe8] sm:$0xff] }
  0x6a   : > { %508 = vmatprep.subr.mxu0 %v1709_v0  ;;  %818 = vmatprep.subr.mxu1 %v1709_v0  ;;  %v249_v30 = vld [vmem:[%s1854_s29 + $0xf8] sm:$0xff] }
  0x6b   : > { %509 = vmatpush1.msra.mxu0 %v414_v31  ;;  %819 = vmatpush1.msra.mxu1 %v446_v32  ;;  %v246_v31 = vld [vmem:[%s1854_s29 + $0xe0] sm:$0xff]  ;;  %v248_v32 = vld [vmem:[%s1854_s29 + $0xf0] sm:$0xff] }
  0x6c   : > { %510 = vmatprep.subr.mxu0 %v1709_v0  ;;  %820 = vmatprep.subr.mxu1 %v1709_v0 }
  0x6d   : > { %511 = vmatpush2.msra.mxu0 %v445_v33  ;;  %821 = vmatpush2.msra.mxu1 %v477_v34  ;;  %v251_v33 = vld [vmem:[%s1854_s29 + $0x108] sm:$0xff]  ;;  %v253_v34 = vld [vmem:[%s1854_s29 + $0x118] sm:$0xff] }
  0x6e   : > { %512 = vmatprep.subr.mxu0 %v1709_v0  ;;  %822 = vmatprep.subr.mxu1 %v1709_v0 }
  0x6f   : > { %513 = vmatpush2.msra.mxu0 %v444_v35  ;;  %823 = vmatpush2.msra.mxu1 %v476_v36  ;;  %v250_v35 = vld [vmem:[%s1854_s29 + $0x100] sm:$0xff]  ;;  %v252_v36 = vld [vmem:[%s1854_s29 + $0x110] sm:$0xff] }
  0x70   : > { %514 = vmatprep.subr.mxu0 %v1709_v0  ;;  %824 = vmatprep.subr.mxu1 %v1709_v0 }
  0x71   : > { %515 = vmatpush2.msra.mxu0 %v443_v37  ;;  %825 = vmatpush2.msra.mxu1 %v475_v38  ;;  %v255_v37 = vld [vmem:[%s1854_s29 + $0x128] sm:$0xff]  ;;  %v257_v38 = vld [vmem:[%s1854_s29 + $0x138] sm:$0xff] }
  0x72   : > { %516 = vmatprep.subr.mxu0 %v1709_v0  ;;  %826 = vmatprep.subr.mxu1 %v1709_v0 }
  0x73   : > { %517 = vmatpush2.msra.mxu0 %v442_v39  ;;  %827 = vmatpush2.msra.mxu1 %v474_v40  ;;  %v254_v39 = vld [vmem:[%s1854_s29 + $0x120] sm:$0xff]  ;;  %v256_v40 = vld [vmem:[%s1854_s29 + $0x130] sm:$0xff] }
  0x74   : > { %518 = vmatprep.subr.mxu0 %v1709_v0  ;;  %828 = vmatprep.subr.mxu1 %v1709_v0 }
  0x75   : > { %519 = vmatpush2.msra.mxu0 %v441_v41  ;;  %829 = vmatpush2.msra.mxu1 %v473_v42  ;;  %v259_v41 = vld [vmem:[%s1854_s29 + $0x148] sm:$0xff]  ;;  %v261_v42 = vld [vmem:[%s1854_s29 + $0x158] sm:$0xff] }
  0x76   : > { %520 = vmatprep.subr.mxu0 %v1709_v0  ;;  %830 = vmatprep.subr.mxu1 %v1709_v0 }
  0x77   : > { %521 = vmatpush2.msra.mxu0 %v440_v43  ;;  %831 = vmatpush2.msra.mxu1 %v472_v44  ;;  %v258_v43 = vld [vmem:[%s1854_s29 + $0x140] sm:$0xff]  ;;  %v260_v44 = vld [vmem:[%s1854_s29 + $0x150] sm:$0xff] }
  0x78   : > { %522 = vmatprep.subr.mxu0 %v1709_v0  ;;  %832 = vmatprep.subr.mxu1 %v1709_v0 }
  0x79   : > { %523 = vmatpush2.msra.mxu0 %v439_v45  ;;  %833 = vmatpush2.msra.mxu1 %v471_v46  ;;  %v263_v45 = vld [vmem:[%s1854_s29 + $0x168] sm:$0xff]  ;;  %v265_v46 = vld [vmem:[%s1854_s29 + $0x178] sm:$0xff] }
  0x7a   : > { %524 = vmatprep.subr.mxu0 %v1709_v0  ;;  %834 = vmatprep.subr.mxu1 %v1709_v0 }
  0x7b   : > { %525 = vmatpush2.msra.mxu0 %v438_v47  ;;  %835 = vmatpush2.msra.mxu1 %v470_v48  ;;  %v262_v47 = vld [vmem:[%s1854_s29 + $0x160] sm:$0xff]  ;;  %v264_v48 = vld [vmem:[%s1854_s29 + $0x170] sm:$0xff] }
  0x7c   : > { %526 = vmatprep.subr.mxu0 %v1709_v0  ;;  %836 = vmatprep.subr.mxu1 %v1709_v0 }
  0x7d   : > { %527 = vmatpush2.msra.mxu0 %v437_v49  ;;  %837 = vmatpush2.msra.mxu1 %v469_v50  ;;  %v267_v49 = vld [vmem:[%s1854_s29 + $0x188] sm:$0xff]  ;;  %v269_v50 = vld [vmem:[%s1854_s29 + $0x198] sm:$0xff] }
  0x7e   : > { %528 = vmatprep.subr.mxu0 %v1709_v0  ;;  %838 = vmatprep.subr.mxu1 %v1709_v0 }
  0x7f   : > { %529 = vmatpush2.msra.mxu0 %v436_v51  ;;  %839 = vmatpush2.msra.mxu1 %v468_v52  ;;  %v266_v51 = vld [vmem:[%s1854_s29 + $0x180] sm:$0xff]  ;;  %v268_v52 = vld [vmem:[%s1854_s29 + $0x190] sm:$0xff] }
  0x80   : > { %530 = vmatprep.subr.mxu0 %v1709_v0  ;;  %840 = vmatprep.subr.mxu1 %v1709_v0 }
  0x81   : > { %531 = vmatpush2.msra.mxu0 %v435_v53  ;;  %841 = vmatpush2.msra.mxu1 %v467_v54  ;;  %v271_v53 = vld [vmem:[%s1854_s29 + $0x1a8] sm:$0xff]  ;;  %v273_v54 = vld [vmem:[%s1854_s29 + $0x1b8] sm:$0xff] }
  0x82   : > { %532 = vmatprep.subr.mxu0 %v1709_v0  ;;  %842 = vmatprep.subr.mxu1 %v1709_v0 }
  0x83   : > { %533 = vmatpush2.msra.mxu0 %v434_v55  ;;  %843 = vmatpush2.msra.mxu1 %v466_v56  ;;  %v270_v55 = vld [vmem:[%s1854_s29 + $0x1a0] sm:$0xff]  ;;  %v272_v56 = vld [vmem:[%s1854_s29 + $0x1b0] sm:$0xff] }
  0x84   : > { %534 = vmatprep.subr.mxu0 %v1709_v0  ;;  %844 = vmatprep.subr.mxu1 %v1709_v0 }
  0x85   : > { %535 = vmatpush2.msra.mxu0 %v433_v57  ;;  %845 = vmatpush2.msra.mxu1 %v465_v58  ;;  %v275_v57 = vld [vmem:[%s1854_s29 + $0x1c8] sm:$0xff]  ;;  %v277_v58 = vld [vmem:[%s1854_s29 + $0x1d8] sm:$0xff] }
  0x86   : > { %536 = vmatprep.subr.mxu0 %v1709_v0  ;;  %846 = vmatprep.subr.mxu1 %v1709_v0 }
  0x87   : > { %537 = vmatpush2.msra.mxu0 %v432_v59  ;;  %847 = vmatpush2.msra.mxu1 %v464_v60  ;;  %v274_v59 = vld [vmem:[%s1854_s29 + $0x1c0] sm:$0xff]  ;;  %v276_v60 = vld [vmem:[%s1854_s29 + $0x1d0] sm:$0xff] }
  0x88   : > { %538 = vmatprep.subr.mxu0 %v1709_v0  ;;  %848 = vmatprep.subr.mxu1 %v1709_v0 }
  0x89   : > { %539 = vmatpush2.msra.mxu0 %v431_v61  ;;  %849 = vmatpush2.msra.mxu1 %v463_v62  ;;  %v279_v61 = vld [vmem:[%s1854_s29 + $0x1e8] sm:$0xff]  ;;  %v281_v62 = vld [vmem:[%s1854_s29 + $0x1f8] sm:$0xff] }
  0x8a   : > { %540 = vmatprep.subr.mxu0 %v1709_v0  ;;  %850 = vmatprep.subr.mxu1 %v1709_v0  ;;  %v224_v0 = vld [vmem:[%s1854_s29 + $0x30] sm:$0xff] }
  0x8b   : > { %541 = vmatpush2.msra.mxu0 %v430_v63  ;;  %542 = vmatprep.mubr.f32.mxu0 %v219_v1  ;;  %v278_v63 = vld [vmem:[%s1854_s29 + $0x1e0] sm:$0xff]  ;;  %v280_v1 = vld [vmem:[%s1854_s29 + $0x1f0] sm:$0xff] }
  0x8c   : > { %851 = vmatpush2.msra.mxu1 %v462_v2  ;;  %852 = vmatprep.mubr.f32.mxu1 %v221_v3  ;;  %v283_v2 = vld [vmem:[%s1854_s29 + $0x208] sm:$0xff]  ;;  %v285_v3 = vld [vmem:[%s1854_s29 + $0x218] sm:$0xff] }
  0x8d   : > { %543 = vmatmul.mubr.f32.vlgmr.msra.gmra.mxu0 %v218_v4  ;;  %853 = vmatmul.mubr.f32.vlgmr.msra.gmra.mxu1 %v220_v5  ;;  %v282_v4 = vld [vmem:[%s1854_s29 + $0x200] sm:$0xff]  ;;  %v284_v5 = vld [vmem:[%s1854_s29 + $0x210] sm:$0xff] }
  0x8e   : > { %547 = vmatprep.mubr.f32.mxu0 %v223_v6  ;;  %857 = vmatprep.mubr.f32.mxu1 %v225_v7  ;;  %v287_v6 = vld [vmem:[%s1854_s29 + $0x228] sm:$0xff]  ;;  %v289_v7 = vld [vmem:[%s1854_s29 + $0x238] sm:$0xff] }
  0x91   : > { %548 = vmatmul.mubr.f32.gmra.mxu0 %v222_v8  ;;  %858 = vmatmul.mubr.f32.gmra.mxu1 %v224_v0  ;;  %v286_v8 = vld [vmem:[%s1854_s29 + $0x220] sm:$0xff]  ;;  %v288_v0 = vld [vmem:[%s1854_s29 + $0x230] sm:$0xff] }
  0x92   : > { %552 = vmatprep.mubr.f32.mxu0 %v227_v9  ;;  %862 = vmatprep.mubr.f32.mxu1 %v229_v10  ;;  %v291_v9 = vld [vmem:[%s1854_s29 + $0x248] sm:$0xff]  ;;  %v293_v10 = vld [vmem:[%s1854_s29 + $0x258] sm:$0xff] }
  0x95   : > { %553 = vmatmul.mubr.f32.gmra.mxu0 %v226_v11  ;;  %863 = vmatmul.mubr.f32.gmra.mxu1 %v228_v12  ;;  %v290_v11 = vld [vmem:[%s1854_s29 + $0x240] sm:$0xff]  ;;  %v292_v12 = vld [vmem:[%s1854_s29 + $0x250] sm:$0xff] }
  0x96   : > { %557 = vmatprep.mubr.f32.mxu0 %v231_v13  ;;  %867 = vmatprep.mubr.f32.mxu1 %v233_v14  ;;  %v295_v13 = vld [vmem:[%s1854_s29 + $0x268] sm:$0xff]  ;;  %v297_v14 = vld [vmem:[%s1854_s29 + $0x278] sm:$0xff] }
  0x99   : > { %558 = vmatmul.mubr.f32.gmra.mxu0 %v230_v15  ;;  %868 = vmatmul.mubr.f32.gmra.mxu1 %v232_v16  ;;  %v294_v15 = vld [vmem:[%s1854_s29 + $0x260] sm:$0xff]  ;;  %v296_v16 = vld [vmem:[%s1854_s29 + $0x270] sm:$0xff] }
  0x9a   : > { %562 = vmatprep.mubr.f32.mxu0 %v235_v17  ;;  %872 = vmatprep.mubr.f32.mxu1 %v237_v18  ;;  %v299_v17 = vld [vmem:[%s1854_s29 + $0x288] sm:$0xff]  ;;  %v301_v18 = vld [vmem:[%s1854_s29 + $0x298] sm:$0xff] }
  0x9d   : > { %563 = vmatmul.mubr.f32.gmra.mxu0 %v234_v19  ;;  %873 = vmatmul.mubr.f32.gmra.mxu1 %v236_v20  ;;  %v298_v19 = vld [vmem:[%s1854_s29 + $0x280] sm:$0xff]  ;;  %v300_v20 = vld [vmem:[%s1854_s29 + $0x290] sm:$0xff] }
  0x9e   : > { %567 = vmatprep.mubr.f32.mxu0 %v239_v21  ;;  %877 = vmatprep.mubr.f32.mxu1 %v241_v22  ;;  %v303_v21 = vld [vmem:[%s1854_s29 + $0x2a8] sm:$0xff]  ;;  %v305_v22 = vld [vmem:[%s1854_s29 + $0x2b8] sm:$0xff] }
  0xa1   : > { %568 = vmatmul.mubr.f32.gmra.mxu0 %v238_v23  ;;  %878 = vmatmul.mubr.f32.gmra.mxu1 %v240_v24  ;;  %v302_v23 = vld [vmem:[%s1854_s29 + $0x2a0] sm:$0xff]  ;;  %v304_v24 = vld [vmem:[%s1854_s29 + $0x2b0] sm:$0xff] }
  0xa2   : > { %572 = vmatprep.mubr.f32.mxu0 %v243_v25  ;;  %882 = vmatprep.mubr.f32.mxu1 %v245_v26  ;;  %v307_v25 = vld [vmem:[%s1854_s29 + $0x2c8] sm:$0xff]  ;;  %v309_v26 = vld [vmem:[%s1854_s29 + $0x2d8] sm:$0xff] }
  0xa5   : > { %573 = vmatmul.mubr.f32.gmra.mxu0 %v242_v27  ;;  %883 = vmatmul.mubr.f32.gmra.mxu1 %v244_v28  ;;  %v306_v27 = vld [vmem:[%s1854_s29 + $0x2c0] sm:$0xff]  ;;  %v308_v28 = vld [vmem:[%s1854_s29 + $0x2d0] sm:$0xff] }
  0xa6   : > { %577 = vmatprep.mubr.f32.mxu0 %v247_v29  ;;  %887 = vmatprep.mubr.f32.mxu1 %v249_v30  ;;  %v311_v29 = vld [vmem:[%s1854_s29 + $0x2e8] sm:$0xff]  ;;  %v313_v30 = vld [vmem:[%s1854_s29 + $0x2f8] sm:$0xff] }
  0xa9   : > { %578 = vmatmul.mubr.f32.gmra.mxu0 %v246_v31  ;;  %888 = vmatmul.mubr.f32.gmra.mxu1 %v248_v32  ;;  %v310_v31 = vld [vmem:[%s1854_s29 + $0x2e0] sm:$0xff]  ;;  %v312_v32 = vld [vmem:[%s1854_s29 + $0x2f0] sm:$0xff] }
  0xaa   : > { %582 = vmatprep.mubr.f32.mxu0 %v251_v33  ;;  %892 = vmatprep.mubr.f32.mxu1 %v253_v34  ;;  %v315_v33 = vld [vmem:[%s1854_s29 + $0x308] sm:$0xff]  ;;  %v317_v34 = vld [vmem:[%s1854_s29 + $0x318] sm:$0xff] }
  0xad   : > { %583 = vmatmul.mubr.f32.gmra.mxu0 %v250_v35  ;;  %893 = vmatmul.mubr.f32.gmra.mxu1 %v252_v36  ;;  %v314_v35 = vld [vmem:[%s1854_s29 + $0x300] sm:$0xff]  ;;  %v316_v36 = vld [vmem:[%s1854_s29 + $0x310] sm:$0xff] }
  0xae   : > { %587 = vmatprep.mubr.f32.mxu0 %v255_v37  ;;  %897 = vmatprep.mubr.f32.mxu1 %v257_v38  ;;  %v319_v37 = vld [vmem:[%s1854_s29 + $0x328] sm:$0xff]  ;;  %v321_v38 = vld [vmem:[%s1854_s29 + $0x338] sm:$0xff] }
  0xb1   : > { %588 = vmatmul.mubr.f32.gmra.mxu0 %v254_v39  ;;  %898 = vmatmul.mubr.f32.gmra.mxu1 %v256_v40  ;;  %v318_v39 = vld [vmem:[%s1854_s29 + $0x320] sm:$0xff]  ;;  %v320_v40 = vld [vmem:[%s1854_s29 + $0x330] sm:$0xff] }
  0xb2   : > { %592 = vmatprep.mubr.f32.mxu0 %v259_v41  ;;  %902 = vmatprep.mubr.f32.mxu1 %v261_v42  ;;  %v323_v41 = vld [vmem:[%s1854_s29 + $0x348] sm:$0xff]  ;;  %v325_v42 = vld [vmem:[%s1854_s29 + $0x358] sm:$0xff] }
  0xb5   : > { %593 = vmatmul.mubr.f32.gmra.mxu0 %v258_v43  ;;  %903 = vmatmul.mubr.f32.gmra.mxu1 %v260_v44  ;;  %v322_v43 = vld [vmem:[%s1854_s29 + $0x340] sm:$0xff]  ;;  %v324_v44 = vld [vmem:[%s1854_s29 + $0x350] sm:$0xff] }
  0xb6   : > { %597 = vmatprep.mubr.f32.mxu0 %v263_v45  ;;  %907 = vmatprep.mubr.f32.mxu1 %v265_v46  ;;  %v327_v45 = vld [vmem:[%s1854_s29 + $0x368] sm:$0xff]  ;;  %v329_v46 = vld [vmem:[%s1854_s29 + $0x378] sm:$0xff] }
  0xb9   : > { %598 = vmatmul.mubr.f32.gmra.mxu0 %v262_v47  ;;  %908 = vmatmul.mubr.f32.gmra.mxu1 %v264_v48  ;;  %v326_v47 = vld [vmem:[%s1854_s29 + $0x360] sm:$0xff]  ;;  %v328_v48 = vld [vmem:[%s1854_s29 + $0x370] sm:$0xff] }
  0xba   : > { %602 = vmatprep.mubr.f32.mxu0 %v267_v49  ;;  %912 = vmatprep.mubr.f32.mxu1 %v269_v50  ;;  %v331_v49 = vld [vmem:[%s1854_s29 + $0x388] sm:$0xff]  ;;  %v333_v50 = vld [vmem:[%s1854_s29 + $0x398] sm:$0xff] }
  0xbd   : > { %603 = vmatmul.mubr.f32.gmra.mxu0 %v266_v51  ;;  %913 = vmatmul.mubr.f32.gmra.mxu1 %v268_v52  ;;  %v330_v51 = vld [vmem:[%s1854_s29 + $0x380] sm:$0xff]  ;;  %v332_v52 = vld [vmem:[%s1854_s29 + $0x390] sm:$0xff] }
  0xbe   : > { %607 = vmatprep.mubr.f32.mxu0 %v271_v53  ;;  %917 = vmatprep.mubr.f32.mxu1 %v273_v54  ;;  %v335_v53 = vld [vmem:[%s1854_s29 + $0x3a8] sm:$0xff]  ;;  %v337_v54 = vld [vmem:[%s1854_s29 + $0x3b8] sm:$0xff] }
  0xc1   : > { %608 = vmatmul.mubr.f32.gmra.mxu0 %v270_v55  ;;  %918 = vmatmul.mubr.f32.gmra.mxu1 %v272_v56  ;;  %v334_v55 = vld [vmem:[%s1854_s29 + $0x3a0] sm:$0xff]  ;;  %v336_v56 = vld [vmem:[%s1854_s29 + $0x3b0] sm:$0xff] }
  0xc2   : > { %612 = vmatprep.mubr.f32.mxu0 %v275_v57  ;;  %922 = vmatprep.mubr.f32.mxu1 %v277_v58  ;;  %v339_v57 = vld [vmem:[%s1854_s29 + $0x3c8] sm:$0xff]  ;;  %v341_v58 = vld [vmem:[%s1854_s29 + $0x3d8] sm:$0xff] }
  0xc5   : > { %613 = vmatmul.mubr.f32.gmra.mxu0 %v274_v59  ;;  %923 = vmatmul.mubr.f32.gmra.mxu1 %v276_v60  ;;  %v338_v59 = vld [vmem:[%s1854_s29 + $0x3c0] sm:$0xff]  ;;  %v340_v60 = vld [vmem:[%s1854_s29 + $0x3d0] sm:$0xff] }
  0xc6   : > { %617 = vmatprep.mubr.f32.mxu0 %v279_v61  ;;  %927 = vmatprep.mubr.f32.mxu1 %v281_v62  ;;  %v343_v61 = vld [vmem:[%s1854_s29 + $0x3e8] sm:$0xff]  ;;  %v345_v62 = vld [vmem:[%s1854_s29 + $0x3f8] sm:$0xff] }
  0xc9   : > { %618 = vmatmul.mubr.f32.gmra.mxu0 %v278_v63  ;;  %928 = vmatmul.mubr.f32.gmra.mxu1 %v280_v1  ;;  %v342_v63 = vld [vmem:[%s1854_s29 + $0x3e0] sm:$0xff]  ;;  %v344_v1 = vld [vmem:[%s1854_s29 + $0x3f0] sm:$0xff] }
  0xca   : > { %622 = vmatprep.mubr.f32.mxu0 %v283_v2  ;;  %932 = vmatprep.mubr.f32.mxu1 %v285_v3  ;;  %v347_v2 = vld [vmem:[%s1854_s29 + $0x408] sm:$0xff]  ;;  %v349_v3 = vld [vmem:[%s1854_s29 + $0x418] sm:$0xff] }
  0xcd   : > { %623 = vmatmul.mubr.f32.gmra.mxu0 %v282_v4  ;;  %933 = vmatmul.mubr.f32.gmra.mxu1 %v284_v5  ;;  %v346_v4 = vld [vmem:[%s1854_s29 + $0x400] sm:$0xff]  ;;  %v348_v5 = vld [vmem:[%s1854_s29 + $0x410] sm:$0xff] }
  0xce   : > { %627 = vmatprep.mubr.f32.mxu0 %v287_v6  ;;  %937 = vmatprep.mubr.f32.mxu1 %v289_v7  ;;  %v351_v6 = vld [vmem:[%s1854_s29 + $0x428] sm:$0xff]  ;;  %v353_v7 = vld [vmem:[%s1854_s29 + $0x438] sm:$0xff] }
  0xd1   : > { %628 = vmatmul.mubr.f32.gmra.mxu0 %v286_v8  ;;  %938 = vmatmul.mubr.f32.gmra.mxu1 %v288_v0  ;;  %v350_v8 = vld [vmem:[%s1854_s29 + $0x420] sm:$0xff]  ;;  %v352_v0 = vld [vmem:[%s1854_s29 + $0x430] sm:$0xff] }
  0xd2   : > { %632 = vmatprep.mubr.f32.mxu0 %v291_v9  ;;  %942 = vmatprep.mubr.f32.mxu1 %v293_v10  ;;  %v355_v9 = vld [vmem:[%s1854_s29 + $0x448] sm:$0xff]  ;;  %v357_v10 = vld [vmem:[%s1854_s29 + $0x458] sm:$0xff] }
  0xd5   : > { %633 = vmatmul.mubr.f32.gmra.mxu0 %v290_v11  ;;  %943 = vmatmul.mubr.f32.gmra.mxu1 %v292_v12  ;;  %v354_v11 = vld [vmem:[%s1854_s29 + $0x440] sm:$0xff]  ;;  %v356_v12 = vld [vmem:[%s1854_s29 + $0x450] sm:$0xff] }
  0xd6   : > { %637 = vmatprep.mubr.f32.mxu0 %v295_v13  ;;  %947 = vmatprep.mubr.f32.mxu1 %v297_v14  ;;  %v359_v13 = vld [vmem:[%s1854_s29 + $0x468] sm:$0xff]  ;;  %v361_v14 = vld [vmem:[%s1854_s29 + $0x478] sm:$0xff] }
  0xd9   : > { %638 = vmatmul.mubr.f32.gmra.mxu0 %v294_v15  ;;  %948 = vmatmul.mubr.f32.gmra.mxu1 %v296_v16  ;;  %v358_v15 = vld [vmem:[%s1854_s29 + $0x460] sm:$0xff]  ;;  %v360_v16 = vld [vmem:[%s1854_s29 + $0x470] sm:$0xff] }
  0xda   : > { %642 = vmatprep.mubr.f32.mxu0 %v299_v17  ;;  %952 = vmatprep.mubr.f32.mxu1 %v301_v18  ;;  %v363_v17 = vld [vmem:[%s1854_s29 + $0x488] sm:$0xff]  ;;  %v365_v18 = vld [vmem:[%s1854_s29 + $0x498] sm:$0xff] }
  0xdd   : > { %643 = vmatmul.mubr.f32.gmra.mxu0 %v298_v19  ;;  %953 = vmatmul.mubr.f32.gmra.mxu1 %v300_v20  ;;  %v362_v19 = vld [vmem:[%s1854_s29 + $0x480] sm:$0xff]  ;;  %v364_v20 = vld [vmem:[%s1854_s29 + $0x490] sm:$0xff] }
  0xde   : > { %647 = vmatprep.mubr.f32.mxu0 %v303_v21  ;;  %957 = vmatprep.mubr.f32.mxu1 %v305_v22  ;;  %v367_v21 = vld [vmem:[%s1854_s29 + $0x4a8] sm:$0xff]  ;;  %v369_v22 = vld [vmem:[%s1854_s29 + $0x4b8] sm:$0xff] }
  0xe1   : > { %648 = vmatmul.mubr.f32.gmra.mxu0 %v302_v23  ;;  %958 = vmatmul.mubr.f32.gmra.mxu1 %v304_v24  ;;  %v366_v23 = vld [vmem:[%s1854_s29 + $0x4a0] sm:$0xff]  ;;  %v368_v24 = vld [vmem:[%s1854_s29 + $0x4b0] sm:$0xff] }
  0xe2   : > { %652 = vmatprep.mubr.f32.mxu0 %v307_v25  ;;  %962 = vmatprep.mubr.f32.mxu1 %v309_v26  ;;  %v371_v25 = vld [vmem:[%s1854_s29 + $0x4c8] sm:$0xff]  ;;  %v373_v26 = vld [vmem:[%s1854_s29 + $0x4d8] sm:$0xff] }
  0xe5   : > { %653 = vmatmul.mubr.f32.gmra.mxu0 %v306_v27  ;;  %963 = vmatmul.mubr.f32.gmra.mxu1 %v308_v28  ;;  %v370_v27 = vld [vmem:[%s1854_s29 + $0x4c0] sm:$0xff]  ;;  %v372_v28 = vld [vmem:[%s1854_s29 + $0x4d0] sm:$0xff] }
  0xe6   : > { %657 = vmatprep.mubr.f32.mxu0 %v311_v29  ;;  %967 = vmatprep.mubr.f32.mxu1 %v313_v30  ;;  %v375_v29 = vld [vmem:[%s1854_s29 + $0x4e8] sm:$0xff]  ;;  %v377_v30 = vld [vmem:[%s1854_s29 + $0x4f8] sm:$0xff] }
  0xe9   : > { %658 = vmatmul.mubr.f32.gmra.mxu0 %v310_v31  ;;  %968 = vmatmul.mubr.f32.gmra.mxu1 %v312_v32  ;;  %v374_v31 = vld [vmem:[%s1854_s29 + $0x4e0] sm:$0xff]  ;;  %v376_v32 = vld [vmem:[%s1854_s29 + $0x4f0] sm:$0xff] }
  0xea   : > { %662 = vmatprep.mubr.f32.mxu0 %v315_v33  ;;  %972 = vmatprep.mubr.f32.mxu1 %v317_v34  ;;  %v379_v33 = vld [vmem:[%s1854_s29 + $0x508] sm:$0xff]  ;;  %v381_v34 = vld [vmem:[%s1854_s29 + $0x518] sm:$0xff] }
  0xed   : > { %663 = vmatmul.mubr.f32.gmra.mxu0 %v314_v35  ;;  %973 = vmatmul.mubr.f32.gmra.mxu1 %v316_v36  ;;  %v378_v35 = vld [vmem:[%s1854_s29 + $0x500] sm:$0xff]  ;;  %v380_v36 = vld [vmem:[%s1854_s29 + $0x510] sm:$0xff] }
  0xee   : > { %667 = vmatprep.mubr.f32.mxu0 %v319_v37  ;;  %977 = vmatprep.mubr.f32.mxu1 %v321_v38  ;;  %v383_v37 = vld [vmem:[%s1854_s29 + $0x528] sm:$0xff]  ;;  %v385_v38 = vld [vmem:[%s1854_s29 + $0x538] sm:$0xff] }
  0xf1   : > { %668 = vmatmul.mubr.f32.gmra.mxu0 %v318_v39  ;;  %978 = vmatmul.mubr.f32.gmra.mxu1 %v320_v40  ;;  %v382_v39 = vld [vmem:[%s1854_s29 + $0x520] sm:$0xff]  ;;  %v384_v40 = vld [vmem:[%s1854_s29 + $0x530] sm:$0xff] }
  0xf2   : > { %672 = vmatprep.mubr.f32.mxu0 %v323_v41  ;;  %982 = vmatprep.mubr.f32.mxu1 %v325_v42  ;;  %v387_v41 = vld [vmem:[%s1854_s29 + $0x548] sm:$0xff]  ;;  %v389_v42 = vld [vmem:[%s1854_s29 + $0x558] sm:$0xff] }
  0xf5   : > { %673 = vmatmul.mubr.f32.gmra.mxu0 %v322_v43  ;;  %983 = vmatmul.mubr.f32.gmra.mxu1 %v324_v44  ;;  %v386_v43 = vld [vmem:[%s1854_s29 + $0x540] sm:$0xff]  ;;  %v388_v44 = vld [vmem:[%s1854_s29 + $0x550] sm:$0xff] }
  0xf6   : > { %677 = vmatprep.mubr.f32.mxu0 %v327_v45  ;;  %987 = vmatprep.mubr.f32.mxu1 %v329_v46  ;;  %v391_v45 = vld [vmem:[%s1854_s29 + $0x568] sm:$0xff]  ;;  %v393_v46 = vld [vmem:[%s1854_s29 + $0x578] sm:$0xff] }
  0xf9   : > { %678 = vmatmul.mubr.f32.gmra.mxu0 %v326_v47  ;;  %988 = vmatmul.mubr.f32.gmra.mxu1 %v328_v48  ;;  %v390_v47 = vld [vmem:[%s1854_s29 + $0x560] sm:$0xff]  ;;  %v392_v48 = vld [vmem:[%s1854_s29 + $0x570] sm:$0xff] }
  0xfa   : > { %682 = vmatprep.mubr.f32.mxu0 %v331_v49  ;;  %992 = vmatprep.mubr.f32.mxu1 %v333_v50  ;;  %v395_v49 = vld [vmem:[%s1854_s29 + $0x588] sm:$0xff]  ;;  %v397_v50 = vld [vmem:[%s1854_s29 + $0x598] sm:$0xff] }
  0xfd   : > { %683 = vmatmul.mubr.f32.gmra.mxu0 %v330_v51  ;;  %993 = vmatmul.mubr.f32.gmra.mxu1 %v332_v52  ;;  %v394_v51 = vld [vmem:[%s1854_s29 + $0x580] sm:$0xff]  ;;  %v396_v52 = vld [vmem:[%s1854_s29 + $0x590] sm:$0xff] }
  0xfe   : > { %687 = vmatprep.mubr.f32.mxu0 %v335_v53  ;;  %997 = vmatprep.mubr.f32.mxu1 %v337_v54  ;;  %v399_v53 = vld [vmem:[%s1854_s29 + $0x5a8] sm:$0xff]  ;;  %v401_v54 = vld [vmem:[%s1854_s29 + $0x5b8] sm:$0xff] }
 0x101   : > { %688 = vmatmul.mubr.f32.gmra.mxu0 %v334_v55  ;;  %998 = vmatmul.mubr.f32.gmra.mxu1 %v336_v56  ;;  %v398_v55 = vld [vmem:[%s1854_s29 + $0x5a0] sm:$0xff]  ;;  %v400_v56 = vld [vmem:[%s1854_s29 + $0x5b0] sm:$0xff] }
 0x102   : > { %692 = vmatprep.mubr.f32.mxu0 %v339_v57  ;;  %1002 = vmatprep.mubr.f32.mxu1 %v341_v58  ;;  %v403_v57 = vld [vmem:[%s1854_s29 + $0x5c8] sm:$0xff]  ;;  %v405_v58 = vld [vmem:[%s1854_s29 + $0x5d8] sm:$0xff] }
 0x105   : > { %693 = vmatmul.mubr.f32.gmra.mxu0 %v338_v59  ;;  %1003 = vmatmul.mubr.f32.gmra.mxu1 %v340_v60  ;;  %v402_v59 = vld [vmem:[%s1854_s29 + $0x5c0] sm:$0xff]  ;;  %v404_v60 = vld [vmem:[%s1854_s29 + $0x5d0] sm:$0xff] }
 0x106   : > { %697 = vmatprep.mubr.f32.mxu0 %v343_v61  ;;  %1007 = vmatprep.mubr.f32.mxu1 %v345_v62  ;;  %v407_v61 = vld [vmem:[%s1854_s29 + $0x5e8] sm:$0xff]  ;;  %v409_v62 = vld [vmem:[%s1854_s29 + $0x5f8] sm:$0xff] }
 0x109   : > { %698 = vmatmul.mubr.f32.gmra.mxu0 %v342_v63  ;;  %1008 = vmatmul.mubr.f32.gmra.mxu1 %v344_v1  ;;  %v406_v63 = vld [vmem:[%s1854_s29 + $0x5e0] sm:$0xff]  ;;  %v408_v1 = vld [vmem:[%s1854_s29 + $0x5f0] sm:$0xff] }
 0x10a   : > { %702 = vmatprep.mubr.f32.mxu0 %v347_v2  ;;  %1012 = vmatprep.mubr.f32.mxu1 %v349_v3  ;;  %v411_v2 = vld [vmem:[%s1854_s29 + $0x608] sm:$0xff]  ;;  %v413_v3 = vld [vmem:[%s1854_s29 + $0x618] sm:$0xff] }
 0x10d   : > { %703 = vmatmul.mubr.f32.gmra.mxu0 %v346_v4  ;;  %1013 = vmatmul.mubr.f32.gmra.mxu1 %v348_v5  ;;  %v410_v4 = vld [vmem:[%s1854_s29 + $0x600] sm:$0xff]  ;;  %v412_v5 = vld [vmem:[%s1854_s29 + $0x610] sm:$0xff] }
 0x10e   : > { %707 = vmatprep.mubr.f32.mxu0 %v351_v6  ;;  %1017 = vmatprep.mubr.f32.mxu1 %v353_v7 }
 0x111   : > { %708 = vmatmul.mubr.f32.gmra.mxu0 %v350_v8  ;;  %1018 = vmatmul.mubr.f32.gmra.mxu1 %v352_v0 }
 0x112   : > { %712 = vmatprep.mubr.f32.mxu0 %v355_v9  ;;  %1022 = vmatprep.mubr.f32.mxu1 %v357_v10 }
 0x115   : > { %713 = vmatmul.mubr.f32.gmra.mxu0 %v354_v11  ;;  %1023 = vmatmul.mubr.f32.gmra.mxu1 %v356_v12 }
 0x116   : > { %717 = vmatprep.mubr.f32.mxu0 %v359_v13  ;;  %1027 = vmatprep.mubr.f32.mxu1 %v361_v14 }
 0x119   : > { %718 = vmatmul.mubr.f32.gmra.mxu0 %v358_v15  ;;  %1028 = vmatmul.mubr.f32.gmra.mxu1 %v360_v16 }
 0x11a   : > { %722 = vmatprep.mubr.f32.mxu0 %v363_v17  ;;  %1032 = vmatprep.mubr.f32.mxu1 %v365_v18 }
 0x11d   : > { %723 = vmatmul.mubr.f32.gmra.mxu0 %v362_v19  ;;  %1033 = vmatmul.mubr.f32.gmra.mxu1 %v364_v20 }
 0x11e   : > { %727 = vmatprep.mubr.f32.mxu0 %v367_v21  ;;  %1037 = vmatprep.mubr.f32.mxu1 %v369_v22 }
 0x121   : > { %728 = vmatmul.mubr.f32.gmra.mxu0 %v366_v23  ;;  %1038 = vmatmul.mubr.f32.gmra.mxu1 %v368_v24 }
 0x122   : > { %732 = vmatprep.mubr.f32.mxu0 %v371_v25  ;;  %1042 = vmatprep.mubr.f32.mxu1 %v373_v26 }
 0x125   : > { %733 = vmatmul.mubr.f32.gmra.mxu0 %v370_v27  ;;  %1043 = vmatmul.mubr.f32.gmra.mxu1 %v372_v28 }
 0x126   : > { %737 = vmatprep.mubr.f32.mxu0 %v375_v29  ;;  %1047 = vmatprep.mubr.f32.mxu1 %v377_v30 }
 0x129   : > { %738 = vmatmul.mubr.f32.gmra.mxu0 %v374_v31  ;;  %1048 = vmatmul.mubr.f32.gmra.mxu1 %v376_v32 }
 0x12a   : > { %742 = vmatprep.mubr.f32.mxu0 %v379_v33  ;;  %1052 = vmatprep.mubr.f32.mxu1 %v381_v34 }
 0x12d   : > { %743 = vmatmul.mubr.f32.gmra.mxu0 %v378_v35  ;;  %1053 = vmatmul.mubr.f32.gmra.mxu1 %v380_v36 }
 0x12e   : > { %747 = vmatprep.mubr.f32.mxu0 %v383_v37  ;;  %1057 = vmatprep.mubr.f32.mxu1 %v385_v38 }
 0x131   : > { %748 = vmatmul.mubr.f32.gmra.mxu0 %v382_v39  ;;  %1058 = vmatmul.mubr.f32.gmra.mxu1 %v384_v40 }
 0x132   : > { %752 = vmatprep.mubr.f32.mxu0 %v387_v41  ;;  %1062 = vmatprep.mubr.f32.mxu1 %v389_v42 }
 0x135   : > { %753 = vmatmul.mubr.f32.gmra.mxu0 %v386_v43  ;;  %1063 = vmatmul.mubr.f32.gmra.mxu1 %v388_v44 }
 0x136   : > { %757 = vmatprep.mubr.f32.mxu0 %v391_v45  ;;  %1067 = vmatprep.mubr.f32.mxu1 %v393_v46 }
 0x139   : > { %758 = vmatmul.mubr.f32.gmra.mxu0 %v390_v47  ;;  %1068 = vmatmul.mubr.f32.gmra.mxu1 %v392_v48 }
 0x13a   : > { %762 = vmatprep.mubr.f32.mxu0 %v395_v49  ;;  %1072 = vmatprep.mubr.f32.mxu1 %v397_v50 }
 0x13d   : > { %763 = vmatmul.mubr.f32.gmra.mxu0 %v394_v51  ;;  %1073 = vmatmul.mubr.f32.gmra.mxu1 %v396_v52 }
 0x13e   : > { %767 = vmatprep.mubr.f32.mxu0 %v399_v53  ;;  %1077 = vmatprep.mubr.f32.mxu1 %v401_v54 }
 0x141   : > { %768 = vmatmul.mubr.f32.gmra.mxu0 %v398_v55  ;;  %1078 = vmatmul.mubr.f32.gmra.mxu1 %v400_v56 }
 0x142   : > { %772 = vmatprep.mubr.f32.mxu0 %v403_v57  ;;  %1082 = vmatprep.mubr.f32.mxu1 %v405_v58 }
 0x145   : > { %773 = vmatmul.mubr.f32.gmra.mxu0 %v402_v59  ;;  %1083 = vmatmul.mubr.f32.gmra.mxu1 %v404_v60 }
 0x146   : > { %777 = vmatprep.mubr.f32.mxu0 %v407_v61  ;;  %1087 = vmatprep.mubr.f32.mxu1 %v409_v62 }
 0x149   : > { %778 = vmatmul.mubr.f32.gmra.mxu0 %v406_v63  ;;  %1088 = vmatmul.mubr.f32.gmra.mxu1 %v408_v1 }
 0x14a   : > { %782 = vmatprep.mubr.f32.mxu0 %v411_v2  ;;  %1092 = vmatprep.mubr.f32.mxu1 %v413_v3 }
 0x14d   : > { %v544_v6 = vpop.f32.mrf.mxu0  ;;  %783 = vmatmul.mubr.f32.gmra.mxu0 %v410_v4  ;;  %v854_v7 = vpop.f32.mrf.mxu1  ;;  %1093 = vmatmul.mubr.f32.gmra.mxu1 %v412_v5 }
 0x14e   : > { %v855_v8 = vadd.f32 %v854_v7, %v544_v6 }
 0x14f   : > { %v546_v0 = vpop.f32.mrf.mxu0  ;;  %v856_v9 = vpop.f32.mrf.mxu1 }
 0x150   : > { %1098 = vst [vmem:[%s2125_s20] sm:$0xff] %v855_v8  ;;  %v1201_v15 = vmul.f32 %v855_v8, %v855_v8 }
 0x151   : > { %v549_v10 = vpop.f32.mrf.mxu0  ;;  %v859_v11 = vpop.f32.mrf.mxu1 }
 0x152   : > { %v860_v12 = vadd.f32 %v859_v11, %v549_v10 }
 0x153   : > { %v551_v13 = vpop.f32.mrf.mxu0  ;;  %v861_v14 = vpop.f32.mrf.mxu1 }
 0x154   : > { %1099 = vst [vmem:[%s2125_s20 + $0x8] sm:$0xff] %v860_v12  ;;  %v1147_v16 = vadd.f32 %v860_v12, %v855_v8  ;;  %v1202_v17 = vmul.f32 %v860_v12, %v860_v12 }
 0x155   : > { %v554_v18 = vpop.f32.mrf.mxu0  ;;  %v864_v19 = vpop.f32.mrf.mxu1 }
 0x156   : > { %v1250_v20 = vadd.f32 %v1202_v17, %v1201_v15  ;;  %v865_v21 = vadd.f32 %v864_v19, %v554_v18 }
 0x157   : > { %v556_v22 = vpop.f32.mrf.mxu0  ;;  %v866_v23 = vpop.f32.mrf.mxu1 }
 0x158   : > { %1100 = vst [vmem:[%s2125_s20 + $0x10] sm:$0xff] %v865_v21  ;;  %v1148_v24 = vadd.f32 %v1147_v16, %v865_v21  ;;  %v1203_v25 = vmul.f32 %v865_v21, %v865_v21 }
 0x159   : > { %v559_v26 = vpop.f32.mrf.mxu0  ;;  %v869_v27 = vpop.f32.mrf.mxu1 }
 0x15a   : > { %v1251_v28 = vadd.f32 %v1250_v20, %v1203_v25  ;;  %v870_v29 = vadd.f32 %v869_v27, %v559_v26 }
 0x15b   : > { %v561_v30 = vpop.f32.mrf.mxu0  ;;  %v871_v31 = vpop.f32.mrf.mxu1 }
 0x15c   : > { %1101 = vst [vmem:[%s2125_s20 + $0x18] sm:$0xff] %v870_v29  ;;  %v1149_v32 = vadd.f32 %v1148_v24, %v870_v29  ;;  %v1204_v33 = vmul.f32 %v870_v29, %v870_v29 }
 0x15d   : > { %v564_v34 = vpop.f32.mrf.mxu0  ;;  %v874_v35 = vpop.f32.mrf.mxu1 }
 0x15e   : > { %v1252_v36 = vadd.f32 %v1251_v28, %v1204_v33  ;;  %v875_v37 = vadd.f32 %v874_v35, %v564_v34 }
 0x15f   : > { %v566_v38 = vpop.f32.mrf.mxu0  ;;  %v876_v39 = vpop.f32.mrf.mxu1 }
 0x160   : > { %1102 = vst [vmem:[%s2125_s20 + $0x20] sm:$0xff] %v875_v37  ;;  %v1150_v40 = vadd.f32 %v1149_v32, %v875_v37  ;;  %v1205_v41 = vmul.f32 %v875_v37, %v875_v37 }
 0x161   : > { %v569_v42 = vpop.f32.mrf.mxu0  ;;  %v879_v43 = vpop.f32.mrf.mxu1 }
 0x162   : > { %v1253_v44 = vadd.f32 %v1252_v36, %v1205_v41  ;;  %v880_v45 = vadd.f32 %v879_v43, %v569_v42 }
 0x163   : > { %v571_v46 = vpop.f32.mrf.mxu0  ;;  %v881_v47 = vpop.f32.mrf.mxu1 }
 0x164   : > { %1103 = vst [vmem:[%s2125_s20 + $0x28] sm:$0xff] %v880_v45  ;;  %v1151_v48 = vadd.f32 %v1150_v40, %v880_v45  ;;  %v1206_v49 = vmul.f32 %v880_v45, %v880_v45 }
 0x165   : > { %v574_v50 = vpop.f32.mrf.mxu0  ;;  %v884_v51 = vpop.f32.mrf.mxu1 }
 0x166   : > { %v1254_v52 = vadd.f32 %v1253_v44, %v1206_v49  ;;  %v885_v53 = vadd.f32 %v884_v51, %v574_v50 }
 0x167   : > { %v576_v54 = vpop.f32.mrf.mxu0  ;;  %v886_v55 = vpop.f32.mrf.mxu1 }
 0x168   : > { %1104 = vst [vmem:[%s2125_s20 + $0x30] sm:$0xff] %v885_v53  ;;  %v1152_v56 = vadd.f32 %v1151_v48, %v885_v53  ;;  %v1207_v57 = vmul.f32 %v885_v53, %v885_v53 }
 0x169   : > { %v579_v58 = vpop.f32.mrf.mxu0  ;;  %v889_v59 = vpop.f32.mrf.mxu1 }
 0x16a   : > { %v1255_v60 = vadd.f32 %v1254_v52, %v1207_v57  ;;  %v890_v61 = vadd.f32 %v889_v59, %v579_v58 }
 0x16b   : > { %v581_v62 = vpop.f32.mrf.mxu0  ;;  %v891_v63 = vpop.f32.mrf.mxu1 }
 0x16c   : > { %1105 = vst [vmem:[%s2125_s20 + $0x38] sm:$0xff] %v890_v61  ;;  %v1153_v1 = vadd.f32 %v1152_v56, %v890_v61  ;;  %v1208_v2 = vmul.f32 %v890_v61, %v890_v61 }
 0x16d   : > { %v584_v3 = vpop.f32.mrf.mxu0  ;;  %v894_v4 = vpop.f32.mrf.mxu1 }
 0x16e   : > { %v1256_v5 = vadd.f32 %v1255_v60, %v1208_v2  ;;  %v895_v6 = vadd.f32 %v894_v4, %v584_v3 }
 0x16f   : > { %v586_v7 = vpop.f32.mrf.mxu0  ;;  %v896_v8 = vpop.f32.mrf.mxu1 }
 0x170   : > { %1106 = vst [vmem:[%s2125_s20 + $0x40] sm:$0xff] %v895_v6  ;;  %v1154_v0 = vadd.f32 %v1153_v1, %v895_v6  ;;  %v1209_v9 = vmul.f32 %v895_v6, %v895_v6 }
 0x171   : > { %v589_v10 = vpop.f32.mrf.mxu0  ;;  %v899_v11 = vpop.f32.mrf.mxu1 }
 0x172   : > { %v1257_v12 = vadd.f32 %v1256_v5, %v1209_v9  ;;  %v900_v13 = vadd.f32 %v899_v11, %v589_v10 }
 0x173   : > { %v591_v14 = vpop.f32.mrf.mxu0  ;;  %v901_v15 = vpop.f32.mrf.mxu1 }
 0x174   : > { %1107 = vst [vmem:[%s2125_s20 + $0x48] sm:$0xff] %v900_v13  ;;  %v1155_v16 = vadd.f32 %v1154_v0, %v900_v13  ;;  %v1210_v17 = vmul.f32 %v900_v13, %v900_v13 }
 0x175   : > { %v594_v18 = vpop.f32.mrf.mxu0  ;;  %v904_v19 = vpop.f32.mrf.mxu1 }
 0x176   : > { %v1258_v20 = vadd.f32 %v1257_v12, %v1210_v17  ;;  %v905_v21 = vadd.f32 %v904_v19, %v594_v18 }
 0x177   : > { %v596_v22 = vpop.f32.mrf.mxu0  ;;  %v906_v23 = vpop.f32.mrf.mxu1 }
 0x178   : > { %1108 = vst [vmem:[%s2125_s20 + $0x50] sm:$0xff] %v905_v21  ;;  %v1156_v24 = vadd.f32 %v1155_v16, %v905_v21  ;;  %v1211_v25 = vmul.f32 %v905_v21, %v905_v21 }
 0x179   : > { %v599_v26 = vpop.f32.mrf.mxu0  ;;  %v909_v27 = vpop.f32.mrf.mxu1 }
 0x17a   : > { %v1259_v28 = vadd.f32 %v1258_v20, %v1211_v25  ;;  %v910_v29 = vadd.f32 %v909_v27, %v599_v26 }
 0x17b   : > { %v601_v30 = vpop.f32.mrf.mxu0  ;;  %v911_v31 = vpop.f32.mrf.mxu1 }
 0x17c   : > { %1109 = vst [vmem:[%s2125_s20 + $0x58] sm:$0xff] %v910_v29  ;;  %v1157_v32 = vadd.f32 %v1156_v24, %v910_v29  ;;  %v1212_v33 = vmul.f32 %v910_v29, %v910_v29 }
 0x17d   : > { %v604_v34 = vpop.f32.mrf.mxu0  ;;  %v914_v35 = vpop.f32.mrf.mxu1 }
 0x17e   : > { %v1260_v36 = vadd.f32 %v1259_v28, %v1212_v33  ;;  %v915_v37 = vadd.f32 %v914_v35, %v604_v34 }
 0x17f   : > { %v606_v38 = vpop.f32.mrf.mxu0  ;;  %v916_v39 = vpop.f32.mrf.mxu1 }
 0x180   : > { %1110 = vst [vmem:[%s2125_s20 + $0x60] sm:$0xff] %v915_v37  ;;  %v1158_v40 = vadd.f32 %v1157_v32, %v915_v37  ;;  %v1213_v41 = vmul.f32 %v915_v37, %v915_v37 }
 0x181   : > { %v609_v42 = vpop.f32.mrf.mxu0  ;;  %v919_v43 = vpop.f32.mrf.mxu1 }
 0x182   : > { %v1261_v44 = vadd.f32 %v1260_v36, %v1213_v41  ;;  %v920_v45 = vadd.f32 %v919_v43, %v609_v42 }
 0x183   : > { %v611_v46 = vpop.f32.mrf.mxu0  ;;  %v921_v47 = vpop.f32.mrf.mxu1 }
 0x184   : > { %1111 = vst [vmem:[%s2125_s20 + $0x68] sm:$0xff] %v920_v45  ;;  %v1159_v48 = vadd.f32 %v1158_v40, %v920_v45  ;;  %v1214_v49 = vmul.f32 %v920_v45, %v920_v45 }
 0x185   : > { %v614_v50 = vpop.f32.mrf.mxu0  ;;  %v924_v51 = vpop.f32.mrf.mxu1 }
 0x186   : > { %v1262_v52 = vadd.f32 %v1261_v44, %v1214_v49  ;;  %v925_v53 = vadd.f32 %v924_v51, %v614_v50 }
 0x187   : > { %v616_v54 = vpop.f32.mrf.mxu0  ;;  %v926_v55 = vpop.f32.mrf.mxu1 }
 0x188   : > { %1112 = vst [vmem:[%s2125_s20 + $0x70] sm:$0xff] %v925_v53  ;;  %v1160_v56 = vadd.f32 %v1159_v48, %v925_v53  ;;  %v1215_v57 = vmul.f32 %v925_v53, %v925_v53 }
 0x189   : > { %v619_v58 = vpop.f32.mrf.mxu0  ;;  %v929_v59 = vpop.f32.mrf.mxu1 }
 0x18a   : > { %v1263_v60 = vadd.f32 %v1262_v52, %v1215_v57  ;;  %v930_v61 = vadd.f32 %v929_v59, %v619_v58 }
 0x18b   : > { %v621_v62 = vpop.f32.mrf.mxu0  ;;  %v931_v63 = vpop.f32.mrf.mxu1 }
 0x18c   : > { %1113 = vst [vmem:[%s2125_s20 + $0x78] sm:$0xff] %v930_v61  ;;  %v1161_v1 = vadd.f32 %v1160_v56, %v930_v61  ;;  %v1216_v2 = vmul.f32 %v930_v61, %v930_v61 }
 0x18d   : > { %v624_v3 = vpop.f32.mrf.mxu0  ;;  %v934_v4 = vpop.f32.mrf.mxu1 }
 0x18e   : > { %v1264_v5 = vadd.f32 %v1263_v60, %v1216_v2  ;;  %v935_v6 = vadd.f32 %v934_v4, %v624_v3 }
 0x18f   : > { %v626_v7 = vpop.f32.mrf.mxu0  ;;  %v936_v8 = vpop.f32.mrf.mxu1 }
 0x190   : > { %1114 = vst [vmem:[%s2125_s20 + $0x80] sm:$0xff] %v935_v6  ;;  %v1162_v0 = vadd.f32 %v1161_v1, %v935_v6  ;;  %v1217_v9 = vmul.f32 %v935_v6, %v935_v6 }
 0x191   : > { %v629_v10 = vpop.f32.mrf.mxu0  ;;  %v939_v11 = vpop.f32.mrf.mxu1 }
 0x192   : > { %v2144_v12 = vadd.f32 %v1264_v5, %v1217_v9  ;;  %v2146_v13 = vadd.f32 %v939_v11, %v629_v10 }
 0x193   : > { %v631_v14 = vpop.f32.mrf.mxu0  ;;  %v941_v15 = vpop.f32.mrf.mxu1 }
 0x194   : > { %1115 = vst [vmem:[%s2125_s20 + $0x88] sm:$0xff] %v2146_v13  ;;  %v2151_v16 = vadd.f32 %v1162_v0, %v2146_v13 }
 0x195   : > { %v634_v17 = vpop.f32.mrf.mxu0  ;;  %v944_v18 = vpop.f32.mrf.mxu1 }
 0x196   : > { %v2153_v19 = vadd.f32 %v944_v18, %v634_v17 }
 0x197   : > { %v636_v20 = vpop.f32.mrf.mxu0  ;;  %v946_v21 = vpop.f32.mrf.mxu1 }
 0x198   : > { %1116 = vst [vmem:[%s2125_s20 + $0x90] sm:$0xff] %v2153_v19 }
 0x199   : > { %v639_v22 = vpop.f32.mrf.mxu0  ;;  %v949_v23 = vpop.f32.mrf.mxu1 }
 0x19a   : > { %v2157_v24 = vadd.f32 %v949_v23, %v639_v22 }
 0x19b   : > { %v641_v25 = vpop.f32.mrf.mxu0  ;;  %v951_v26 = vpop.f32.mrf.mxu1 }
 0x19c   : > { %1117 = vst [vmem:[%s2125_s20 + $0x98] sm:$0xff] %v2157_v24 }
 0x19d   : > { %v644_v27 = vpop.f32.mrf.mxu0  ;;  %v954_v28 = vpop.f32.mrf.mxu1 }
 0x19e   : > { %v2161_v29 = vadd.f32 %v954_v28, %v644_v27 }
 0x19f   : > { %v646_v30 = vpop.f32.mrf.mxu0  ;;  %v956_v31 = vpop.f32.mrf.mxu1 }
 0x1a0   : > { %1118 = vst [vmem:[%s2125_s20 + $0xa0] sm:$0xff] %v2161_v29 }
 0x1a1   : > { %v649_v32 = vpop.f32.mrf.mxu0  ;;  %v959_v33 = vpop.f32.mrf.mxu1 }
 0x1a2   : > { %v2165_v34 = vadd.f32 %v959_v33, %v649_v32 }
 0x1a3   : > { %v651_v35 = vpop.f32.mrf.mxu0  ;;  %v961_v36 = vpop.f32.mrf.mxu1 }
 0x1a4   : > { %1119 = vst [vmem:[%s2125_s20 + $0xa8] sm:$0xff] %v2165_v34  ;;  %v1218_v35 = vmul.f32 %v2146_v13, %v2146_v13  ;;  %v1220_v13 = vmul.f32 %v2157_v24, %v2157_v24 }
 0x1a5   : > { %v654_v37 = vpop.f32.mrf.mxu0  ;;  %v964_v38 = vpop.f32.mrf.mxu1 }
 0x1a6   : > { %v2169_v39 = vadd.f32 %v964_v38, %v654_v37  ;;  %v1219_v38 = vmul.f32 %v2153_v19, %v2153_v19 }
 0x1a7   : > { %v656_v40 = vpop.f32.mrf.mxu0  ;;  %v966_v41 = vpop.f32.mrf.mxu1 }
 0x1a8   : > { %1120 = vst [vmem:[%s2125_s20 + $0xb0] sm:$0xff] %v2169_v39 }
 0x1a9   : > { %v659_v42 = vpop.f32.mrf.mxu0  ;;  %v969_v43 = vpop.f32.mrf.mxu1 }
 0x1aa   : > { %v2173_v44 = vadd.f32 %v969_v43, %v659_v42  ;;  %v1266_v43 = vadd.f32 %v2144_v12, %v1218_v35 }
 0x1ab   : > { %v661_v45 = vpop.f32.mrf.mxu0  ;;  %v971_v46 = vpop.f32.mrf.mxu1 }
 0x1ac   : > { %1121 = vst [vmem:[%s2125_s20 + $0xb8] sm:$0xff] %v2173_v44  ;;  %v1164_v45 = vadd.f32 %v2151_v16, %v2153_v19  ;;  %v1222_v19 = vmul.f32 %v2165_v34, %v2165_v34 }
 0x1ad   : > { %v664_v47 = vpop.f32.mrf.mxu0  ;;  %v974_v48 = vpop.f32.mrf.mxu1 }
 0x1ae   : > { %v2177_v49 = vadd.f32 %v974_v48, %v664_v47  ;;  %v1267_v48 = vadd.f32 %v1266_v43, %v1219_v38 }
 0x1af   : > { %v666_v50 = vpop.f32.mrf.mxu0  ;;  %v976_v51 = vpop.f32.mrf.mxu1 }
 0x1b0   : > { %1122 = vst [vmem:[%s2125_s20 + $0xc0] sm:$0xff] %v2177_v49  ;;  %v1165_v50 = vadd.f32 %v1164_v45, %v2157_v24  ;;  %v1221_v51 = vmul.f32 %v2161_v29, %v2161_v29 }
 0x1b1   : > { %v669_v52 = vpop.f32.mrf.mxu0  ;;  %v979_v53 = vpop.f32.mrf.mxu1 }
 0x1b2   : > { %v2181_v54 = vadd.f32 %v979_v53, %v669_v52  ;;  %v1166_v16 = vadd.f32 %v1165_v50, %v2161_v29 }
 0x1b3   : > { %v671_v55 = vpop.f32.mrf.mxu0  ;;  %v981_v56 = vpop.f32.mrf.mxu1 }
 0x1b4   : > { %1123 = vst [vmem:[%s2125_s20 + $0xc8] sm:$0xff] %v2181_v54  ;;  %v1268_v55 = vadd.f32 %v1267_v48, %v1220_v13  ;;  %v1167_v24 = vadd.f32 %v1166_v16, %v2165_v34 }
 0x1b5   : > { %v674_v57 = vpop.f32.mrf.mxu0  ;;  %v984_v58 = vpop.f32.mrf.mxu1 }
 0x1b6   : > { %v2185_v59 = vadd.f32 %v984_v58, %v674_v57  ;;  %v1269_v58 = vadd.f32 %v1268_v55, %v1221_v51  ;;  %v1168_v29 = vadd.f32 %v1167_v24, %v2169_v39 }
 0x1b7   : > { %v676_v60 = vpop.f32.mrf.mxu0  ;;  %v986_v61 = vpop.f32.mrf.mxu1 }
 0x1b8   : > { %1124 = vst [vmem:[%s2125_s20 + $0xd0] sm:$0xff] %v2185_v59  ;;  %v1223_v60 = vmul.f32 %v2169_v39, %v2169_v39  ;;  %v1169_v34 = vadd.f32 %v1168_v29, %v2173_v44 }
 0x1b9   : > { %v679_v62 = vpop.f32.mrf.mxu0  ;;  %v989_v63 = vpop.f32.mrf.mxu1 }
 0x1ba   : > { %v2189_v1 = vadd.f32 %v989_v63, %v679_v62  ;;  %v1170_v39 = vadd.f32 %v1169_v34, %v2177_v49 }
 0x1bb   : > { %v681_v2 = vpop.f32.mrf.mxu0  ;;  %v991_v3 = vpop.f32.mrf.mxu1 }
 0x1bc   : > { %1125 = vst [vmem:[%s2125_s20 + $0xd8] sm:$0xff] %v2189_v1  ;;  %v1270_v2 = vadd.f32 %v1269_v58, %v1222_v19  ;;  %v1224_v3 = vmul.f32 %v2173_v44, %v2173_v44  ;;  %v1171_v44 = vadd.f32 %v1170_v39, %v2181_v54 }
 0x1bd   : > { %v684_v4 = vpop.f32.mrf.mxu0  ;;  %v994_v5 = vpop.f32.mrf.mxu1 }
 0x1be   : > { %v2193_v6 = vadd.f32 %v994_v5, %v684_v4 }
 0x1bf   : > { %v686_v7 = vpop.f32.mrf.mxu0  ;;  %v996_v8 = vpop.f32.mrf.mxu1 }
 0x1c0   : > { %1126 = vst [vmem:[%s2125_s20 + $0xe0] sm:$0xff] %v2193_v6  ;;  %v1271_v7 = vadd.f32 %v1270_v2, %v1223_v60  ;;  %v1225_v8 = vmul.f32 %v2177_v49, %v2177_v49  ;;  %v1172_v49 = vadd.f32 %v1171_v44, %v2185_v59 }
 0x1c1   : > { %v689_v0 = vpop.f32.mrf.mxu0  ;;  %v999_v9 = vpop.f32.mrf.mxu1 }
 0x1c2   : > { %v2197_v10 = vadd.f32 %v999_v9, %v689_v0 }
 0x1c3   : > { %v691_v11 = vpop.f32.mrf.mxu0  ;;  %v1001_v14 = vpop.f32.mrf.mxu1 }
 0x1c4   : > { %1127 = vst [vmem:[%s2125_s20 + $0xe8] sm:$0xff] %v2197_v10  ;;  %v1272_v14 = vadd.f32 %v1271_v7, %v1224_v3  ;;  %v1230_v43 = vmul.f32 %v2197_v10, %v2197_v10 }
 0x1c5   : > { %v694_v15 = vpop.f32.mrf.mxu0  ;;  %v1004_v17 = vpop.f32.mrf.mxu1 }
 0x1c6   : > { %v2201_v18 = vadd.f32 %v1004_v17, %v694_v15  ;;  %v1226_v15 = vmul.f32 %v2181_v54, %v2181_v54  ;;  %v1173_v54 = vadd.f32 %v1172_v49, %v2189_v1 }
 0x1c7   : > { %v696_v20 = vpop.f32.mrf.mxu0  ;;  %v1006_v21 = vpop.f32.mrf.mxu1 }
 0x1c8   : > { %1128 = vst [vmem:[%s2125_s20 + $0xf0] sm:$0xff] %v2201_v18  ;;  %v1273_v21 = vadd.f32 %v1272_v14, %v1225_v8 }
 0x1c9   : > { %v699_v22 = vpop.f32.mrf.mxu0  ;;  %v1009_v23 = vpop.f32.mrf.mxu1 }
 0x1ca   : > { %v2205_v25 = vadd.f32 %v1009_v23, %v699_v22  ;;  %v1227_v22 = vmul.f32 %v2185_v59, %v2185_v59  ;;  %v1174_v59 = vadd.f32 %v1173_v54, %v2193_v6 }
 0x1cb   : > { %v701_v26 = vpop.f32.mrf.mxu0  ;;  %v1011_v27 = vpop.f32.mrf.mxu1 }
 0x1cc   : > { %1129 = vst [vmem:[%s2125_s20 + $0xf8] sm:$0xff] %v2205_v25 }
 0x1cd   : > { %v704_v28 = vpop.f32.mrf.mxu0  ;;  %v1014_v30 = vpop.f32.mrf.mxu1 }
 0x1ce   : > { %v2209_v31 = vadd.f32 %v1014_v30, %v704_v28  ;;  %v1274_v28 = vadd.f32 %v1273_v21, %v1226_v15  ;;  %v1228_v30 = vmul.f32 %v2189_v1, %v2189_v1  ;;  %v1175_v1 = vadd.f32 %v1174_v59, %v2197_v10 }
 0x1cf   : > { %v706_v32 = vpop.f32.mrf.mxu0  ;;  %v1016_v33 = vpop.f32.mrf.mxu1 }
 0x1d0   : > { %1130 = vst [vmem:[%s2125_s20 + $0x100] sm:$0xff] %v2209_v31  ;;  %v1275_v35 = vadd.f32 %v1274_v28, %v1227_v22  ;;  %v1233_v10 = vmul.f32 %v2209_v31, %v2209_v31 }
 0x1d1   : > { %v709_v36 = vpop.f32.mrf.mxu0  ;;  %v1019_v37 = vpop.f32.mrf.mxu1 }
 0x1d2   : > { %v2217_v40 = vadd.f32 %v1019_v37, %v709_v36  ;;  %v1229_v36 = vmul.f32 %v2193_v6, %v2193_v6  ;;  %v1176_v6 = vadd.f32 %v1175_v1, %v2201_v18 }
 0x1d3   : > { %v711_v41 = vpop.f32.mrf.mxu0  ;;  %v1021_v42 = vpop.f32.mrf.mxu1 }
 0x1d4   : > { %1131 = vst [vmem:[%s2125_s20 + $0x108] sm:$0xff] %v2217_v40  ;;  %v1276_v42 = vadd.f32 %v1275_v35, %v1228_v30 }
 0x1d5   : > { %v714_v46 = vpop.f32.mrf.mxu0  ;;  %v1024_v47 = vpop.f32.mrf.mxu1 }
 0x1d6   : > { %v2229_v52 = vadd.f32 %v1024_v47, %v714_v46  ;;  %v1277_v46 = vadd.f32 %v1276_v42, %v1229_v36  ;;  %v1231_v47 = vmul.f32 %v2201_v18, %v2201_v18  ;;  %v1234_v18 = vmul.f32 %v2217_v40, %v2217_v40 }
 0x1d7   : > { %v716_v53 = vpop.f32.mrf.mxu0  ;;  %v1026_v12 = vpop.f32.mrf.mxu1 }
 0x1d8   : > { %1132 = vst [vmem:[%s2125_s20 + $0x110] sm:$0xff] %v2229_v52  ;;  %v1278_v53 = vadd.f32 %v1277_v46, %v1230_v43  ;;  %v1232_v12 = vmul.f32 %v2205_v25, %v2205_v25 }
 0x1d9   : > { %v719_v56 = vpop.f32.mrf.mxu0  ;;  %v1029_v57 = vpop.f32.mrf.mxu1 }
 0x1da   : > { %v2239_v61 = vadd.f32 %v1029_v57, %v719_v56  ;;  %v1279_v19 = vadd.f32 %v1278_v53, %v1231_v47  ;;  %v1177_v56 = vadd.f32 %v1176_v6, %v2205_v25  ;;  %v1235_v25 = vmul.f32 %v2229_v52, %v2229_v52 }
 0x1db   : > { %v721_v62 = vpop.f32.mrf.mxu0  ;;  %v1031_v63 = vpop.f32.mrf.mxu1 }
 0x1dc   : > { %1133 = vst [vmem:[%s2125_s20 + $0x118] sm:$0xff] %v2239_v61  ;;  %v1280_v60 = vadd.f32 %v1279_v19, %v1232_v12  ;;  %v1178_v62 = vadd.f32 %v1177_v56, %v2209_v31  ;;  %v1236_v31 = vmul.f32 %v2239_v61, %v2239_v61 }
 0x1dd   : > { %v724_v4 = vpop.f32.mrf.mxu0  ;;  %v1034_v5 = vpop.f32.mrf.mxu1 }
 0x1de   : > { %v2249_v0 = vadd.f32 %v1034_v5, %v724_v4  ;;  %v1281_v29 = vadd.f32 %v1280_v60, %v1233_v10  ;;  %v1179_v3 = vadd.f32 %v1178_v62, %v2217_v40 }
 0x1df   : > { %v726_v9 = vpop.f32.mrf.mxu0  ;;  %v1036_v11 = vpop.f32.mrf.mxu1 }
 0x1e0   : > { %1134 = vst [vmem:[%s2125_s20 + $0x120] sm:$0xff] %v2249_v0  ;;  %v1282_v34 = vadd.f32 %v1281_v29, %v1234_v18  ;;  %v1180_v8 = vadd.f32 %v1179_v3, %v2229_v52  ;;  %v1237_v40 = vmul.f32 %v2249_v0, %v2249_v0 }
 0x1e1   : > { %v729_v17 = vpop.f32.mrf.mxu0  ;;  %v1039_v20 = vpop.f32.mrf.mxu1 }
 0x1e2   : > { %v2259_v23 = vadd.f32 %v1039_v20, %v729_v17  ;;  %v1283_v14 = vadd.f32 %v1282_v34, %v1235_v25  ;;  %v1181_v39 = vadd.f32 %v1180_v8, %v2239_v61 }
 0x1e3   : > { %v731_v26 = vpop.f32.mrf.mxu0  ;;  %v1041_v27 = vpop.f32.mrf.mxu1 }
 0x1e4   : > { %1135 = vst [vmem:[%s2125_s20 + $0x128] sm:$0xff] %v2259_v23  ;;  %v1284_v21 = vadd.f32 %v1283_v14, %v1236_v31  ;;  %v1182_v44 = vadd.f32 %v1181_v39, %v2249_v0  ;;  %v1238_v52 = vmul.f32 %v2259_v23, %v2259_v23 }
 0x1e5   : > { %v734_v32 = vpop.f32.mrf.mxu0  ;;  %v1044_v33 = vpop.f32.mrf.mxu1 }
 0x1e6   : > { %v2269_v37 = vadd.f32 %v1044_v33, %v734_v32  ;;  %v1285_v27 = vadd.f32 %v1284_v21, %v1237_v40  ;;  %v1183_v28 = vadd.f32 %v1182_v44, %v2259_v23 }
 0x1e7   : > { %v736_v38 = vpop.f32.mrf.mxu0  ;;  %v1046_v41 = vpop.f32.mrf.mxu1 }
 0x1e8   : > { %1136 = vst [vmem:[%s2125_s20 + $0x130] sm:$0xff] %v2269_v37  ;;  %v1239_v61 = vmul.f32 %v2269_v37, %v2269_v37  ;;  %v1286_v33 = vadd.f32 %v1285_v27, %v1238_v52  ;;  %v1184_v35 = vadd.f32 %v1183_v28, %v2269_v37 }
 0x1e9   : > { %v739_v45 = vpop.f32.mrf.mxu0  ;;  %v1049_v13 = vpop.f32.mrf.mxu1 }
 0x1ea   : > { %v1050_v48 = vadd.f32 %v1049_v13, %v739_v45  ;;  %v1287_v38 = vadd.f32 %v1286_v33, %v1239_v61 }
 0x1eb   : > { %v741_v50 = vpop.f32.mrf.mxu0  ;;  %v1051_v51 = vpop.f32.mrf.mxu1 }
 0x1ec   : > { %1137 = vst [vmem:[%s2125_s20 + $0x138] sm:$0xff] %v1050_v48  ;;  %v1240_v0 = vmul.f32 %v1050_v48, %v1050_v48  ;;  %v1185_v41 = vadd.f32 %v1184_v35, %v1050_v48 }
 0x1ed   : > { %v744_v55 = vpop.f32.mrf.mxu0  ;;  %v1054_v16 = vpop.f32.mrf.mxu1 }
 0x1ee   : > { %v1055_v57 = vadd.f32 %v1054_v16, %v744_v55  ;;  %v1288_v45 = vadd.f32 %v1287_v38, %v1240_v0 }
 0x1ef   : > { %v746_v58 = vpop.f32.mrf.mxu0  ;;  %v1056_v24 = vpop.f32.mrf.mxu1 }
 0x1f0   : > { %1138 = vst [vmem:[%s2125_s20 + $0x140] sm:$0xff] %v1055_v57  ;;  %v1241_v42 = vmul.f32 %v1055_v57, %v1055_v57  ;;  %v1186_v13 = vadd.f32 %v1185_v41, %v1055_v57 }
 0x1f1   : > { %v749_v63 = vpop.f32.mrf.mxu0  ;;  %v1059_v2 = vpop.f32.mrf.mxu1 }
 0x1f2   : > { %v1060_v4 = vadd.f32 %v1059_v2, %v749_v63  ;;  %v1289_v50 = vadd.f32 %v1288_v45, %v1241_v42 }
 0x1f3   : > { %v751_v5 = vpop.f32.mrf.mxu0  ;;  %v1061_v7 = vpop.f32.mrf.mxu1 }
 0x1f4   : > { %1139 = vst [vmem:[%s2125_s20 + $0x148] sm:$0xff] %v1060_v4  ;;  %v1242_v46 = vmul.f32 %v1060_v4, %v1060_v4  ;;  %v1187_v51 = vadd.f32 %v1186_v13, %v1060_v4 }
 0x1f5   : > { %v754_v9 = vpop.f32.mrf.mxu0  ;;  %v1064_v11 = vpop.f32.mrf.mxu1 }
 0x1f6   : > { %v1065_v15 = vadd.f32 %v1064_v11, %v754_v9  ;;  %v1290_v55 = vadd.f32 %v1289_v50, %v1242_v46 }
 0x1f7   : > { %v756_v17 = vpop.f32.mrf.mxu0  ;;  %v1066_v20 = vpop.f32.mrf.mxu1 }
 0x1f8   : > { %1140 = vst [vmem:[%s2125_s20 + $0x150] sm:$0xff] %v1065_v15  ;;  %v1243_v37 = vmul.f32 %v1065_v15, %v1065_v15  ;;  %v1188_v48 = vadd.f32 %v1187_v51, %v1065_v15 }
 0x1f9   : > { %v759_v22 = vpop.f32.mrf.mxu0  ;;  %v1069_v26 = vpop.f32.mrf.mxu1 }
 0x1fa   : > { %v1070_v49 = vadd.f32 %v1069_v26, %v759_v22  ;;  %v1291_v10 = vadd.f32 %v1290_v55, %v1243_v37 }
 0x1fb   : > { %v761_v30 = vpop.f32.mrf.mxu0  ;;  %v1071_v32 = vpop.f32.mrf.mxu1 }
 0x1fc   : > { %1141 = vst [vmem:[%s2125_s20 + $0x158] sm:$0xff] %v1070_v49  ;;  %v1244_v16 = vmul.f32 %v1070_v49, %v1070_v49  ;;  %v1189_v57 = vadd.f32 %v1188_v48, %v1070_v49 }
 0x1fd   : > { %v764_v54 = vpop.f32.mrf.mxu0  ;;  %v1074_v36 = vpop.f32.mrf.mxu1 }
 0x1fe   : > { %v1075_v59 = vadd.f32 %v1074_v36, %v764_v54  ;;  %v1292_v18 = vadd.f32 %v1291_v10, %v1244_v16 }
 0x1ff   : > { %v766_v43 = vpop.f32.mrf.mxu0  ;;  %v1076_v23 = vpop.f32.mrf.mxu1 }
 0x200   : > { %1142 = vst [vmem:[%s2125_s20 + $0x160] sm:$0xff] %v1075_v59  ;;  %v1245_v58 = vmul.f32 %v1075_v59, %v1075_v59  ;;  %v1190_v63 = vadd.f32 %v1189_v57, %v1075_v59 }
 0x201   : > { %v769_v1 = vpop.f32.mrf.mxu0  ;;  %v1079_v47 = vpop.f32.mrf.mxu1 }
 0x202   : > { %v1080_v53 = vadd.f32 %v1079_v47, %v769_v1  ;;  %v1293_v25 = vadd.f32 %v1292_v18, %v1245_v58 }
 0x203   : > { %v771_v6 = vpop.f32.mrf.mxu0  ;;  %v1081_v12 = vpop.f32.mrf.mxu1 }
 0x204   : > { %1143 = vst [vmem:[%s2125_s20 + $0x168] sm:$0xff] %v1080_v53  ;;  %v1246_v2 = vmul.f32 %v1080_v53, %v1080_v53  ;;  %v1191_v4 = vadd.f32 %v1190_v63, %v1080_v53 }
 0x205   : > { %v774_v19 = vpop.f32.mrf.mxu0  ;;  %v1084_v56 = vpop.f32.mrf.mxu1 }
 0x206   : > { %v1085_v24 = vadd.f32 %v1084_v56, %v774_v19  ;;  %v1294_v31 = vadd.f32 %v1293_v25, %v1246_v2 }
 0x207   : > { %v776_v60 = vpop.f32.mrf.mxu0  ;;  %v1086_v62 = vpop.f32.mrf.mxu1 }
 0x208   : > { %1144 = vst [vmem:[%s2125_s20 + $0x170] sm:$0xff] %v1085_v24  ;;  %v1247_v5 = vmul.f32 %v1085_v24, %v1085_v24  ;;  %v1192_v9 = vadd.f32 %v1191_v4, %v1085_v24 }
 0x209   : > { %v779_v29 = vpop.f32.mrf.mxu0  ;;  %v1089_v3 = vpop.f32.mrf.mxu1 }
 0x20a   : > { %v1090_v7 = vadd.f32 %v1089_v3, %v779_v29  ;;  %v1295_v40 = vadd.f32 %v1294_v31, %v1247_v5 }
 0x20b   : > { %v781_v34 = vpop.f32.mrf.mxu0  ;;  %v1091_v8 = vpop.f32.mrf.mxu1 }
 0x20c   : > { %1145 = vst [vmem:[%s2125_s20 + $0x178] sm:$0xff] %v1090_v7  ;;  %v1248_v11 = vmul.f32 %v1090_v7, %v1090_v7  ;;  %v1193_v15 = vadd.f32 %v1192_v9, %v1090_v7 }
 0x20d   : > { %v784_v14 = vpop.f32.mrf.mxu0  ;;  %v1094_v39 = vpop.f32.mrf.mxu1 }
 0x20e   : > { %v1095_v17 = vadd.f32 %v1094_v39, %v784_v14  ;;  %v1296_v44 = vadd.f32 %v1295_v40, %v1248_v11 }
 0x20f   : > { %v786_v20 = vpop.f32.mrf.mxu0  ;;  %v1096_v21 = vpop.f32.mrf.mxu1 }
 0x210   : > { %1146 = vst [vmem:[%s2125_s20 + $0x180] sm:$0xff] %v1095_v17  ;;  %v1194_v52 = vadd.f32 %v1193_v15, %v1095_v17  ;;  %v1249_v22 = vmul.f32 %v1095_v17, %v1095_v17 }
 0x211   : > { %1616 = shalt.err (!%p1613_p0)
}
 0x212   : > { %s1617_s11 = scalar_lea.hbm %s2318_s30, 6272  ;;  %s1621_s28 = scalar_lea.hbm %s2384_s2, 12544 }
 0x213   : > { %p1618_p5 = scmp.ne.s32.totalorder %s2318_s30, %s1617_s11  ;;  %p1622_p4 = scmp.lt.s32.totalorder %s2318_s30, %s2384_s2 }
 0x214   : > { %p1623_p6 = scmp.lt.s32.totalorder %s1621_s28, %s1617_s11 }
 0x215   : > { %p1619_p9 = pnand %p1618_p5, %p2401_p11 }
 0x216   : > { %p1624_p8 = por %p1623_p6, %p1622_p4 }
 0x217   : > { %p1620_p1 = pneg %p1619_p9 }
 0x219   : > { %p1625_p3 = pnand %p1624_p8, %p1620_p1 }
 0x21b   : > { %1628 = shalt.err (!%p1625_p3)
}
 0x21c   : > { %s1711_s20 = smov 128   ;;  %s1712_s17 = smov 8   ;;  %v1195_v26 = vrot.slane %v1194_v52, 4  ;;  %v1297_v27 = vadd.f32 %v1296_v44, %v1249_v22  ;;  %v1304_v49 = vlaneseq }
 0x21d   : > { %1486 = dma.vmem_to_hbm [thread:$0]  (%p2401_p11), %s2320_s21, 6272, %s2318_s30, %s1313_s4, %s1711_s20, %s1711_s20, %s1712_s17  }
 0x21e   : > { %v1196_v28 = vadd.f32 %v1195_v26, %v1194_v52  ;;  %v1298_v61 = vrot.slane %v1297_v27, 4  ;;  %s1467_s23 = sshll.u32 %s1850_s26, 3  ;;  %v1305_v0 = vshrl.u32 %v1304_v49, 7  ;;  %s1470_s21 = sshll.u32 %s1755_s16, 7 }
 0x21f   : > { %s215_s25 = scalar_lea.vmem [#allocation8], %s1467_s23  ;;  %s1345_s8 = scalar_lea.hbm %s2385_s3, %s1470_s21 }
 0x220   : > { %v1197_v30 = vrot.slane %v1196_v28, 2  ;;  %v1299_v32 = vadd.f32 %v1298_v61, %v1297_v27  ;;  %vm1306_vm0 = vcmp.eq.s32.totalorder %v1305_v0, 0  ;;  %vm1308_vm1 = vcmp.eq.s32.totalorder %v1305_v0, 1  ;;  %s1347_s30 = sshll.u32 %s215_s25, 4  ;;  %s1318_s9 = scalar_lea.sflag [#allocation9], %s1850_s26  ;;  %s1348_s30 = int_to_ptr.vmem [resolvable:$true] %s1347_s30 }
 0x221   : > { %s1629_s10 = scalar_lea.vmem %s1348_s30, 128  ;;  %s1713_s11 = smov [#allocation8]  }
 0x222   : > { %v1198_v33 = vadd.f32 %v1197_v30, %v1196_v28  ;;  %v1300_v35 = vrot.slane %v1299_v32, 2  ;;  %p1630_p7 = scmp.ne.s32.totalorder %s1348_s30, %s1629_s10  ;;  %s1633_s22 = sshll.u32 %s1713_s11, 4  ;;  %s1634_s22 = int_to_ptr.vmem [resolvable:$false] %s1633_s22 }
 0x223   : > { %s1635_s16 = scalar_lea.vmem %s1634_s22, 256  ;;  %p1636_p2 = scmp.lt.s32.totalorder %s1348_s30, %s1634_s22 }
 0x224   : > { %v1199_v54 = vrot.slane %v1198_v33, 1  ;;  %v1301_v36 = vadd.f32 %v1300_v35, %v1299_v32  ;;  %p1631_p12 = pnand %p1630_p7, %p2401_p11  ;;  %p1637_p13 = scmp.lt.s32.totalorder %s1635_s16, %s1629_s10 }
 0x226   : > { %v1200_v38 = vadd.f32 %v1199_v54, %v1198_v33  ;;  %v1302_v41 = vrot.slane %v1301_v36, 1  ;;  %p1632_p10 = pneg %p1631_p12  ;;  %p1638_p0 = por %p1637_p13, %p1636_p2 }
 0x228   : > { %v1303_v42 = vadd.f32 %v1302_v41, %v1301_v36  ;;  %v1307_v59 = vsel %vm1306_vm0, %v1200_v38, 0.0  ;;  %p1639_p5 = pnand %p1638_p0, %p1632_p10 }
 0x22a   : > { %v1309_v43 = vsel %vm1308_vm1, %v1303_v42, 0.0 }
 0x22b   : > { %v1310_v23 = vadd.f32 %v1309_v43, %v1307_v59 }
 0x22d   : > { %1311 = vst [vmem:[%s215_s25] sm:$0xff] %v1310_v23 }
 0x22e   : > { %1642 = shalt.err (!%p1639_p5)
}
 0x22f   : > { %s1643_s27 = scalar_lea.hbm %s1345_s8, 128  ;;  %s1647_s29 = scalar_lea.hbm %s2385_s3, 256 }
 0x230   : > { %p1644_p9 = scmp.ne.s32.totalorder %s1345_s8, %s1643_s27  ;;  %p1648_p6 = scmp.lt.s32.totalorder %s1345_s8, %s2385_s3 }
 0x231   : > { %p1649_p8 = scmp.lt.s32.totalorder %s1647_s29, %s1643_s27 }
 0x232   : > { %p1645_p1 = pnand %p1644_p9, %p2401_p11 }
 0x233   : > { %p1650_p3 = por %p1649_p8, %p1648_p6 }
 0x234   : > { %p1646_p4 = pneg %p1645_p1 }
 0x236   : > { %p1651_p7 = pnand %p1650_p3, %p1646_p4 }
 0x238   : > { %1654 = shalt.err (!%p1651_p7)
}
 0x239   : > { %1487 = dma.vmem_to_hbm [thread:$0]  (%p2401_p11), %s1348_s30, 128, %s1345_s8, %s1318_s9  }
 0x23a PF: > { %s1359_s17 = sand.u32 1, %s1689_s12   ;;  %p2402_p12 = scmp.ne.s32.totalorder %s2391_s19, 0 }
 0x23b   : > { %p2403_p10 = scmp.ge.s32.totalorder %s1701_s15, 2  ;;  %s1360_s23 = scalar_lea.sflag [#allocation4], %s1359_s17 }
 0x23d   : > { %p1499_p2 = pnand %p2403_p10, %p2402_p12 }
 0x23f   : > { %p1500_p13 = pneg %p1499_p2 }
 0x241   : > { %1680 = dma.done.wait (%p1500_p13), %s1360_s23, 6272  }
 0x242   : > { %1682 = vsyncadd (%p1500_p13), %s1360_s23, 4294961024  ;;  %s1369_s21 = scalar_lea.sflag [#allocation9], %s1359_s17 }
 0x243   : > { %1684 = dma.done.wait (%p1500_p13), %s1369_s21, 128  }
 0x244   : > { %1686 = vsyncadd (%p1500_p13), %s1369_s21, 4294967168  ;;  %p21_p11 = scmp.ge.s32.totalorder %s1788_s24, 4   ;;  %s2404_s12 = smov %s1693_s13 }
 0x245   : > { %s2405_s13 = smov %s1697_s14  ;;  %s2406_s14 = smov %s1805_s5 }
 0x246   : > { %s2407_s15 = smov %s1788_s24  ;;  %23 = sbr.rel (!%p21_p11) target bundleno = 8 (0x8), region = 94 }
 0x24b   :  { %1374 = vsyncpa [#allocation3], 1 }
 0x24c   :  { %1376 = vsyncpa [#allocation3 + $0x1], 1 }
 0x24d   :  { %1377 = vsyncpa [#allocation6], 1 }
 0x24e   :  { %1378 = vsyncpa [#allocation4], 1 }
 0x24f   :  { %1380 = vsyncpa [#allocation4 + $0x1], 1 }
 0x250   :  { %1381 = vsyncpa [#allocation9], 1 }
 0x251   :  { %1383 = vsyncpa [#allocation9 + $0x1], 1 }

</bundles_post_ra>
